<compile_context>
chip_gen: v6e
topology: v6e:2x2x1
jax: 0.10.0
libtpu: 0.0.40
codegen_flags: <defaults>
</compile_context>

<pallas_src>
import functools

import jax
import jax.numpy as jnp
from jax.experimental import pallas as pl
from jax.experimental.pallas import tpu as pltpu


# ------------------------------ fused kernel ------------------------------

def _lowrank_fused_kernel(a_ref, v_ref, sel_ref,
                          pw1, pb1, pw2, pb2, pw3, pb3, pw4, pb4,
                          qw1, qb1, qw2, qb2, qw3, qb3, qw4, qb4,
                          o_ref, *, out_ch, in_ch, n_pts):
    # Blocks (one batch element per grid step), N on the lane axis throughout:
    #   a_ref (1, 2, N)   v_ref (1, in_ch, N)   sel_ref (out_ch, W)
    #   weights w^T (out_dim, in_dim), biases b^T (out_dim, 1)
    #   o_ref (1, out_ch, N)
    a_t = a_ref[0]                           # (2, N)
    x0 = a_t[0:1, :]                         # (1, N)
    x1 = a_t[1:2, :]                         # (1, N)
    v_t = v_ref[0]                           # (in_ch, N)

    def tower(w1, b1, w2, b2, w3, b3, w4, b4):
        # Transposed MLP: h^T = W^T @ x^T, N stays lane-dense.
        # Layer 1 has K=2 -> two VPU broadcast FMAs instead of an MXU matmul
        # that would leave the systolic array almost empty.
        w1a = w1[...]                                                        # (64, 2)
        h = jnp.maximum(w1a[:, 0:1] * x0 + w1a[:, 1:2] * x1 + b1[...], 0.0)  # (64, N)
        h = jnp.maximum(jnp.dot(w2[...], h, preferred_element_type=jnp.float32)
                        + b2[...], 0.0)                                      # (128, N)
        h = jnp.maximum(jnp.dot(w3[...], h, preferred_element_type=jnp.float32)
                        + b3[...], 0.0)                                      # (256, N)
        return (jnp.dot(w4[...], h, preferred_element_type=jnp.float32)
                + b4[...])                                                   # (W, N)

    psi_t = tower(qw1, qb1, qw2, qb2, qw3, qb3, qw4, qb4)                    # (W, N)
    phi_t = tower(pw1, pb1, pw2, pb2, pw3, pb3, pw4, pb4)                    # (W, N)

    # t[w] = (1/N) * sum_n psi[n, w] * v[n, w % in_ch]
    # v replicated along sublanes (cheap), reduction over the lane axis,
    # 1/N folded into the tiny (W, 1) vector instead of the (out_ch, N) output.
    v_rep = jnp.tile(v_t, (out_ch, 1))                                       # (W, N)
    t = jnp.sum(psi_t * v_rep, axis=1, keepdims=True) * (1.0 / float(n_pts)) # (W, 1)

    # out^T[o, m] = sum_w sel[o, w] * t[w] * phi^T[w, m]
    # One MXU matmul against the precomputed 0/1 block-selector; the store of
    # (out_ch, N) is lane-dense / unmasked.
    o_ref[0] = jnp.dot(sel_ref[...], phi_t * t,
                       preferred_element_type=jnp.float32)                   # (out_ch, N)


# -------------------------------- wrapper ---------------------------------

def lowrank_forward(v, a, phi_params, psi_params, out_channels, in_channels, rank=1):
    assert rank == 1  # TODO(synk): in-kernel lane/sublane layout for rank > 1
    B, N, _ = a.shape
    W = out_channels * in_channels * rank

    # Layout plumbing (wrapper-side, not compute): put N on the lane axis.
    a_t = jnp.transpose(a, (0, 2, 1)).astype(jnp.float32)        # (B, 2, N)
    v_t = jnp.transpose(v, (0, 2, 1)).astype(jnp.float32)        # (B, in_ch, N)

    def transpose_params(params):
        flat = []
        for w, b in params:
            flat.append(jnp.asarray(w, jnp.float32).T)            # (out_dim, in_dim)
            flat.append(jnp.asarray(b, jnp.float32).reshape(-1, 1))  # (out_dim, 1)
        return flat

    flat_w = transpose_params(phi_params) + transpose_params(psi_params)

    # Static 0/1 block-selector, hoisted out of the kernel (grid-invariant).
    w_idx = jax.lax.broadcasted_iota(jnp.int32, (out_channels, W), 1)
    o_idx = jax.lax.broadcasted_iota(jnp.int32, (out_channels, W), 0)
    sel = jnp.logical_and(w_idx >= o_idx * in_channels,
                          w_idx < (o_idx + 1) * in_channels).astype(jnp.float32)

    def full2d(arr):
        # whole small array resident in VMEM across the grid
        return pl.BlockSpec(arr.shape, lambda b: (0, 0))

    kernel = functools.partial(_lowrank_fused_kernel,
                               out_ch=out_channels, in_ch=in_channels, n_pts=N)

    out_t = pl.pallas_call(
        kernel,
        out_shape=jax.ShapeDtypeStruct((B, out_channels, N), jnp.float32),
        grid=(B,),
        in_specs=[pl.BlockSpec((1, 2, N), lambda b: (b, 0, 0)),
                  pl.BlockSpec((1, in_channels, N), lambda b: (b, 0, 0)),
                  full2d(sel)]
                 + [full2d(w) for w in flat_w],
        out_specs=pl.BlockSpec((1, out_channels, N), lambda b: (b, 0, 0)),
        compiler_params=pltpu.CompilerParams(dimension_semantics=("parallel",)),
    )(a_t, v_t, sel, *flat_w)

    return jnp.transpose(out_t, (0, 2, 1))                        # (B, N, out_ch)


# ------------------------------ parameter init ------------------------------

def init_densenet(key, layers):
    """Deterministic nn.Linear-style init: U(-1/sqrt(fan_in), 1/sqrt(fan_in))."""
    params = []
    for i in range(len(layers) - 1):
        key, k_w, k_b = jax.random.split(key, 3)
        bound = 1.0 / float(layers[i]) ** 0.5
        w = jax.random.uniform(k_w, (layers[i], layers[i + 1]), jnp.float32, -bound, bound)
        b = jax.random.uniform(k_b, (1, layers[i + 1]), jnp.float32, -bound, bound)
        params.append((w, b))
    return params


# -------------------------------- reference ---------------------------------

def reference(v, a, phi_params, psi_params, out_channels, in_channels, rank):
    def mlp(x, params):
        for j, (w, b) in enumerate(params):
            x = x @ w + b
            if j < len(params) - 1:
                x = jnp.maximum(x, 0.0)
        return x

    B, N, _ = a.shape
    phi_eval = mlp(a, phi_params).reshape(B, N, out_channels, in_channels, rank)
    psi_eval = mlp(a, psi_params).reshape(B, N, out_channels, in_channels, rank)
    return jnp.einsum('bnoir,bni,bmoir->bmo', psi_eval, v, phi_eval) / N


# ----------------------------------- main ------------------------------------

if __name__ == "__main__":
    key = jax.random.PRNGKey(0)
    B, N = 2, 128                 # small stand-ins for batch_size=5, s=2**13//8
    width, rank = 4, 1            # in_channels = out_channels = width
    in_channels = out_channels = width

    k_phi, k_psi, k_v, k_a = jax.random.split(key, 4)
    layers = [2, 64, 128, 256, width * width * rank]
    phi_params = init_densenet(k_phi, layers)
    psi_params = init_densenet(k_psi, layers)

    v = jax.random.normal(k_v, (B, N, in_channels), jnp.float32)
    a = jax.random.normal(k_a, (B, N, 2), jnp.float32)

    out = lowrank_forward(v, a, phi_params, psi_params, out_channels, in_channels, rank)
    out = jax.block_until_ready(out)

    ref = reference(v, a, phi_params, psi_params, out_channels, in_channels, rank)
    assert out.shape == (B, N, out_channels)
    err = float(jnp.max(jnp.abs(out - ref)))
    assert jnp.allclose(out, ref, rtol=1e-4, atol=1e-4), f"max abs err {err}"
    print("KERNEL_OK")
</pallas_src>

<mosaic_0001>
module attributes {stable_mosaic.version = 11 : i64} {
  func.func @_lowrank_fused_kernel(%arg0: i32, %arg1: memref<1x2x128xf32, #tpu.memory_space<vmem>>, %arg2: memref<1x4x128xf32, #tpu.memory_space<vmem>>, %arg3: memref<4x16xf32, #tpu.memory_space<vmem>>, %arg4: memref<64x2xf32, #tpu.memory_space<vmem>>, %arg5: memref<64x1xf32, #tpu.memory_space<vmem>>, %arg6: memref<128x64xf32, #tpu.memory_space<vmem>>, %arg7: memref<128x1xf32, #tpu.memory_space<vmem>>, %arg8: memref<256x128xf32, #tpu.memory_space<vmem>>, %arg9: memref<256x1xf32, #tpu.memory_space<vmem>>, %arg10: memref<16x256xf32, #tpu.memory_space<vmem>>, %arg11: memref<16x1xf32, #tpu.memory_space<vmem>>, %arg12: memref<64x2xf32, #tpu.memory_space<vmem>>, %arg13: memref<64x1xf32, #tpu.memory_space<vmem>>, %arg14: memref<128x64xf32, #tpu.memory_space<vmem>>, %arg15: memref<128x1xf32, #tpu.memory_space<vmem>>, %arg16: memref<256x128xf32, #tpu.memory_space<vmem>>, %arg17: memref<256x1xf32, #tpu.memory_space<vmem>>, %arg18: memref<16x256xf32, #tpu.memory_space<vmem>>, %arg19: memref<16x1xf32, #tpu.memory_space<vmem>>, %arg20: memref<1x4x128xf32, #tpu.memory_space<vmem>>) attributes {dimension_semantics = [#tpu.dimension_semantics<parallel>], iteration_bounds = array<i64: 2>, scalar_prefetch = 0 : i64, scratch_operands = 0 : i64, tpu.core_type = #tpu.core_type<tc>, window_params = [{transform_indices = @transform_0, window_bounds = array<i64: 1, 2, 128>}, {transform_indices = @transform_1, window_bounds = array<i64: 1, 4, 128>}, {pipeline_mode = #tpu.pipeline_mode<synchronous>, transform_indices = @transform_2, window_bounds = array<i64: 4, 16>}, {pipeline_mode = #tpu.pipeline_mode<synchronous>, transform_indices = @transform_3, window_bounds = array<i64: 64, 2>}, {pipeline_mode = #tpu.pipeline_mode<synchronous>, transform_indices = @transform_4, window_bounds = array<i64: 64, 1>}, {pipeline_mode = #tpu.pipeline_mode<synchronous>, transform_indices = @transform_5, window_bounds = array<i64: 128, 64>}, {pipeline_mode = #tpu.pipeline_mode<synchronous>, transform_indices = @transform_6, window_bounds = array<i64: 128, 1>}, {pipeline_mode = #tpu.pipeline_mode<synchronous>, transform_indices = @transform_7, window_bounds = array<i64: 256, 128>}, {pipeline_mode = #tpu.pipeline_mode<synchronous>, transform_indices = @transform_8, window_bounds = array<i64: 256, 1>}, {pipeline_mode = #tpu.pipeline_mode<synchronous>, transform_indices = @transform_9, window_bounds = array<i64: 16, 256>}, {pipeline_mode = #tpu.pipeline_mode<synchronous>, transform_indices = @transform_10, window_bounds = array<i64: 16, 1>}, {pipeline_mode = #tpu.pipeline_mode<synchronous>, transform_indices = @transform_11, window_bounds = array<i64: 64, 2>}, {pipeline_mode = #tpu.pipeline_mode<synchronous>, transform_indices = @transform_12, window_bounds = array<i64: 64, 1>}, {pipeline_mode = #tpu.pipeline_mode<synchronous>, transform_indices = @transform_13, window_bounds = array<i64: 128, 64>}, {pipeline_mode = #tpu.pipeline_mode<synchronous>, transform_indices = @transform_14, window_bounds = array<i64: 128, 1>}, {pipeline_mode = #tpu.pipeline_mode<synchronous>, transform_indices = @transform_15, window_bounds = array<i64: 256, 128>}, {pipeline_mode = #tpu.pipeline_mode<synchronous>, transform_indices = @transform_16, window_bounds = array<i64: 256, 1>}, {pipeline_mode = #tpu.pipeline_mode<synchronous>, transform_indices = @transform_17, window_bounds = array<i64: 16, 256>}, {pipeline_mode = #tpu.pipeline_mode<synchronous>, transform_indices = @transform_18, window_bounds = array<i64: 16, 1>}, {transform_indices = @transform_19, window_bounds = array<i64: 1, 4, 128>}]} {
    %c0 = arith.constant 0 : index
    %c0_0 = arith.constant 0 : index
    %c0_1 = arith.constant 0 : index
    %0 = vector.load %arg1[%c0, %c0_0, %c0_1] : memref<1x2x128xf32, #tpu.memory_space<vmem>>, vector<1x2x128xf32>
    %1 = vector.shape_cast %0 : vector<1x2x128xf32> to vector<2x128xf32>
    %2 = vector.extract_strided_slice %1 {offsets = [0, 0], sizes = [1, 128], strides = [1, 1]} : vector<2x128xf32> to vector<1x128xf32>
    %3 = vector.extract_strided_slice %1 {offsets = [1, 0], sizes = [1, 128], strides = [1, 1]} : vector<2x128xf32> to vector<1x128xf32>
    %c0_2 = arith.constant 0 : index
    %c0_3 = arith.constant 0 : index
    %c0_4 = arith.constant 0 : index
    %4 = vector.load %arg2[%c0_2, %c0_3, %c0_4] : memref<1x4x128xf32, #tpu.memory_space<vmem>>, vector<1x4x128xf32>
    %5 = vector.shape_cast %4 : vector<1x4x128xf32> to vector<4x128xf32>
    %c0_5 = arith.constant 0 : index
    %c0_6 = arith.constant 0 : index
    %6 = vector.load %arg12[%c0_5, %c0_6] : memref<64x2xf32, #tpu.memory_space<vmem>>, vector<64x2xf32>
    %7 = vector.extract_strided_slice %6 {offsets = [0, 0], sizes = [64, 1], strides = [1, 1]} : vector<64x2xf32> to vector<64x1xf32>
    %8 = vector.broadcast %7 : vector<64x1xf32> to vector<64x128xf32>
    %9 = vector.broadcast %2 : vector<1x128xf32> to vector<64x128xf32>
    %10 = arith.mulf %8, %9 : vector<64x128xf32>
    %11 = vector.extract_strided_slice %6 {offsets = [0, 1], sizes = [64, 1], strides = [1, 1]} : vector<64x2xf32> to vector<64x1xf32>
    %12 = vector.broadcast %11 : vector<64x1xf32> to vector<64x128xf32>
    %13 = vector.broadcast %3 : vector<1x128xf32> to vector<64x128xf32>
    %14 = arith.mulf %12, %13 : vector<64x128xf32>
    %15 = arith.addf %10, %14 : vector<64x128xf32>
    %c0_7 = arith.constant 0 : index
    %c0_8 = arith.constant 0 : index
    %16 = vector.load %arg13[%c0_7, %c0_8] : memref<64x1xf32, #tpu.memory_space<vmem>>, vector<64x1xf32>
    %17 = vector.broadcast %16 : vector<64x1xf32> to vector<64x128xf32>
    %18 = arith.addf %15, %17 : vector<64x128xf32>
    %cst = arith.constant 0.000000e+00 : f32
    %19 = vector.broadcast %cst : f32 to vector<64x128xf32>
    %20 = arith.maximumf %18, %19 : vector<64x128xf32>
    %c0_9 = arith.constant 0 : index
    %c0_10 = arith.constant 0 : index
    %21 = vector.load %arg14[%c0_9, %c0_10] : memref<128x64xf32, #tpu.memory_space<vmem>>, vector<128x64xf32>
    %cst_11 = arith.constant dense<0.000000e+00> : vector<128x128xf32>
    %22 = tpu.matmul %21, %20, %cst_11 {dimension_numbers = #tpu.dot_dimension_numbers<[1], [0], [0], [1], [0, 0, 1, 1], [], []>} : vector<128x64xf32>, vector<64x128xf32>, vector<128x128xf32> -> vector<128x128xf32>
    %c0_12 = arith.constant 0 : index
    %c0_13 = arith.constant 0 : index
    %23 = vector.load %arg15[%c0_12, %c0_13] : memref<128x1xf32, #tpu.memory_space<vmem>>, vector<128x1xf32>
    %24 = vector.broadcast %23 : vector<128x1xf32> to vector<128x128xf32>
    %25 = arith.addf %22, %24 : vector<128x128xf32>
    %cst_14 = arith.constant 0.000000e+00 : f32
    %26 = vector.broadcast %cst_14 : f32 to vector<128x128xf32>
    %27 = arith.maximumf %25, %26 : vector<128x128xf32>
    %c0_15 = arith.constant 0 : index
    %c0_16 = arith.constant 0 : index
    %28 = vector.load %arg16[%c0_15, %c0_16] : memref<256x128xf32, #tpu.memory_space<vmem>>, vector<256x128xf32>
    %cst_17 = arith.constant dense<0.000000e+00> : vector<256x128xf32>
    %29 = tpu.matmul %28, %27, %cst_17 {dimension_numbers = #tpu.dot_dimension_numbers<[1], [0], [0], [1], [0, 0, 1, 1], [], []>} : vector<256x128xf32>, vector<128x128xf32>, vector<256x128xf32> -> vector<256x128xf32>
    %c0_18 = arith.constant 0 : index
    %c0_19 = arith.constant 0 : index
    %30 = vector.load %arg17[%c0_18, %c0_19] : memref<256x1xf32, #tpu.memory_space<vmem>>, vector<256x1xf32>
    %31 = vector.broadcast %30 : vector<256x1xf32> to vector<256x128xf32>
    %32 = arith.addf %29, %31 : vector<256x128xf32>
    %cst_20 = arith.constant 0.000000e+00 : f32
    %33 = vector.broadcast %cst_20 : f32 to vector<256x128xf32>
    %34 = arith.maximumf %32, %33 : vector<256x128xf32>
    %c0_21 = arith.constant 0 : index
    %c0_22 = arith.constant 0 : index
    %35 = vector.load %arg18[%c0_21, %c0_22] : memref<16x256xf32, #tpu.memory_space<vmem>>, vector<16x256xf32>
    %cst_23 = arith.constant dense<0.000000e+00> : vector<16x128xf32>
    %36 = tpu.matmul %35, %34, %cst_23 {dimension_numbers = #tpu.dot_dimension_numbers<[1], [0], [0], [1], [0, 0, 1, 1], [], []>} : vector<16x256xf32>, vector<256x128xf32>, vector<16x128xf32> -> vector<16x128xf32>
    %c0_24 = arith.constant 0 : index
    %c0_25 = arith.constant 0 : index
    %37 = vector.load %arg19[%c0_24, %c0_25] : memref<16x1xf32, #tpu.memory_space<vmem>>, vector<16x1xf32>
    %38 = vector.broadcast %37 : vector<16x1xf32> to vector<16x128xf32>
    %39 = arith.addf %36, %38 : vector<16x128xf32>
    %c0_26 = arith.constant 0 : index
    %c0_27 = arith.constant 0 : index
    %40 = vector.load %arg4[%c0_26, %c0_27] : memref<64x2xf32, #tpu.memory_space<vmem>>, vector<64x2xf32>
    %41 = vector.extract_strided_slice %40 {offsets = [0, 0], sizes = [64, 1], strides = [1, 1]} : vector<64x2xf32> to vector<64x1xf32>
    %42 = vector.broadcast %41 : vector<64x1xf32> to vector<64x128xf32>
    %43 = vector.broadcast %2 : vector<1x128xf32> to vector<64x128xf32>
    %44 = arith.mulf %42, %43 : vector<64x128xf32>
    %45 = vector.extract_strided_slice %40 {offsets = [0, 1], sizes = [64, 1], strides = [1, 1]} : vector<64x2xf32> to vector<64x1xf32>
    %46 = vector.broadcast %45 : vector<64x1xf32> to vector<64x128xf32>
    %47 = vector.broadcast %3 : vector<1x128xf32> to vector<64x128xf32>
    %48 = arith.mulf %46, %47 : vector<64x128xf32>
    %49 = arith.addf %44, %48 : vector<64x128xf32>
    %c0_28 = arith.constant 0 : index
    %c0_29 = arith.constant 0 : index
    %50 = vector.load %arg5[%c0_28, %c0_29] : memref<64x1xf32, #tpu.memory_space<vmem>>, vector<64x1xf32>
    %51 = vector.broadcast %50 : vector<64x1xf32> to vector<64x128xf32>
    %52 = arith.addf %49, %51 : vector<64x128xf32>
    %cst_30 = arith.constant 0.000000e+00 : f32
    %53 = vector.broadcast %cst_30 : f32 to vector<64x128xf32>
    %54 = arith.maximumf %52, %53 : vector<64x128xf32>
    %c0_31 = arith.constant 0 : index
    %c0_32 = arith.constant 0 : index
    %55 = vector.load %arg6[%c0_31, %c0_32] : memref<128x64xf32, #tpu.memory_space<vmem>>, vector<128x64xf32>
    %cst_33 = arith.constant dense<0.000000e+00> : vector<128x128xf32>
    %56 = tpu.matmul %55, %54, %cst_33 {dimension_numbers = #tpu.dot_dimension_numbers<[1], [0], [0], [1], [0, 0, 1, 1], [], []>} : vector<128x64xf32>, vector<64x128xf32>, vector<128x128xf32> -> vector<128x128xf32>
    %c0_34 = arith.constant 0 : index
    %c0_35 = arith.constant 0 : index
    %57 = vector.load %arg7[%c0_34, %c0_35] : memref<128x1xf32, #tpu.memory_space<vmem>>, vector<128x1xf32>
    %58 = vector.broadcast %57 : vector<128x1xf32> to vector<128x128xf32>
    %59 = arith.addf %56, %58 : vector<128x128xf32>
    %cst_36 = arith.constant 0.000000e+00 : f32
    %60 = vector.broadcast %cst_36 : f32 to vector<128x128xf32>
    %61 = arith.maximumf %59, %60 : vector<128x128xf32>
    %c0_37 = arith.constant 0 : index
    %c0_38 = arith.constant 0 : index
    %62 = vector.load %arg8[%c0_37, %c0_38] : memref<256x128xf32, #tpu.memory_space<vmem>>, vector<256x128xf32>
    %cst_39 = arith.constant dense<0.000000e+00> : vector<256x128xf32>
    %63 = tpu.matmul %62, %61, %cst_39 {dimension_numbers = #tpu.dot_dimension_numbers<[1], [0], [0], [1], [0, 0, 1, 1], [], []>} : vector<256x128xf32>, vector<128x128xf32>, vector<256x128xf32> -> vector<256x128xf32>
    %c0_40 = arith.constant 0 : index
    %c0_41 = arith.constant 0 : index
    %64 = vector.load %arg9[%c0_40, %c0_41] : memref<256x1xf32, #tpu.memory_space<vmem>>, vector<256x1xf32>
    %65 = vector.broadcast %64 : vector<256x1xf32> to vector<256x128xf32>
    %66 = arith.addf %63, %65 : vector<256x128xf32>
    %cst_42 = arith.constant 0.000000e+00 : f32
    %67 = vector.broadcast %cst_42 : f32 to vector<256x128xf32>
    %68 = arith.maximumf %66, %67 : vector<256x128xf32>
    %c0_43 = arith.constant 0 : index
    %c0_44 = arith.constant 0 : index
    %69 = vector.load %arg10[%c0_43, %c0_44] : memref<16x256xf32, #tpu.memory_space<vmem>>, vector<16x256xf32>
    %cst_45 = arith.constant dense<0.000000e+00> : vector<16x128xf32>
    %70 = tpu.matmul %69, %68, %cst_45 {dimension_numbers = #tpu.dot_dimension_numbers<[1], [0], [0], [1], [0, 0, 1, 1], [], []>} : vector<16x256xf32>, vector<256x128xf32>, vector<16x128xf32> -> vector<16x128xf32>
    %c0_46 = arith.constant 0 : index
    %c0_47 = arith.constant 0 : index
    %71 = vector.load %arg11[%c0_46, %c0_47] : memref<16x1xf32, #tpu.memory_space<vmem>>, vector<16x1xf32>
    %72 = vector.broadcast %71 : vector<16x1xf32> to vector<16x128xf32>
    %73 = arith.addf %70, %72 : vector<16x128xf32>
    %74 = tpu.concatenate %5, %5, %5, %5 in 0 : vector<4x128xf32>, vector<4x128xf32>, vector<4x128xf32>, vector<4x128xf32> -> vector<16x128xf32>
    %75 = arith.mulf %39, %74 : vector<16x128xf32>
    %cst_48 = arith.constant dense<0.000000e+00> : vector<16xf32>
    %76 = vector.multi_reduction <add>, %75, %cst_48 [1] : vector<16x128xf32> to vector<16xf32>
    %77 = vector.shape_cast %76 : vector<16xf32> to vector<16x1xf32>
    %cst_49 = arith.constant 7.812500e-03 : f32
    %78 = vector.broadcast %cst_49 : f32 to vector<16x1xf32>
    %79 = arith.mulf %77, %78 : vector<16x1xf32>
    %c0_50 = arith.constant 0 : index
    %c0_51 = arith.constant 0 : index
    %80 = vector.load %arg3[%c0_50, %c0_51] : memref<4x16xf32, #tpu.memory_space<vmem>>, vector<4x16xf32>
    %81 = vector.broadcast %79 : vector<16x1xf32> to vector<16x128xf32>
    %82 = arith.mulf %73, %81 : vector<16x128xf32>
    %cst_52 = arith.constant dense<0.000000e+00> : vector<4x128xf32>
    %83 = tpu.matmul %80, %82, %cst_52 {dimension_numbers = #tpu.dot_dimension_numbers<[1], [0], [0], [1], [0, 0, 1, 1], [], []>} : vector<4x16xf32>, vector<16x128xf32>, vector<4x128xf32> -> vector<4x128xf32>
    %c0_53 = arith.constant 0 : index
    %c0_54 = arith.constant 0 : index
    %c0_55 = arith.constant 0 : index
    %84 = vector.load %arg20[%c0_53, %c0_54, %c0_55] : memref<1x4x128xf32, #tpu.memory_space<vmem>>, vector<1x4x128xf32>
    %85 = vector.shape_cast %84 : vector<1x4x128xf32> to vector<4x128xf32>
    %86 = vector.shape_cast %83 : vector<4x128xf32> to vector<1x4x128xf32>
    tpu.vector_store %arg20[%c0_53, %c0_54, %c0_55], %86 {strides = array<i32>} : memref<1x4x128xf32, #tpu.memory_space<vmem>>, vector<1x4x128xf32>,
    return
  }
  func.func @transform_0(%arg0: i32) -> (i32, i32, i32) {
    %c0_i32 = arith.constant 0 : i32
    %c0_i32_0 = arith.constant 0 : i32
    %c0_i32_1 = arith.constant 0 : i32
    return %arg0, %c0_i32, %c0_i32_0 : i32, i32, i32
  }
  func.func @transform_1(%arg0: i32) -> (i32, i32, i32) {
    %c0_i32 = arith.constant 0 : i32
    %c0_i32_0 = arith.constant 0 : i32
    %c0_i32_1 = arith.constant 0 : i32
    return %arg0, %c0_i32, %c0_i32_0 : i32, i32, i32
  }
  func.func @transform_2(%arg0: i32) -> (i32, i32) {
    %c0_i32 = arith.constant 0 : i32
    %c0_i32_0 = arith.constant 0 : i32
    %c0_i32_1 = arith.constant 0 : i32
    return %c0_i32, %c0_i32_0 : i32, i32
  }
  func.func @transform_3(%arg0: i32) -> (i32, i32) {
    %c0_i32 = arith.constant 0 : i32
    %c0_i32_0 = arith.constant 0 : i32
    %c0_i32_1 = arith.constant 0 : i32
    return %c0_i32, %c0_i32_0 : i32, i32
  }
  func.func @transform_4(%arg0: i32) -> (i32, i32) {
    %c0_i32 = arith.constant 0 : i32
    %c0_i32_0 = arith.constant 0 : i32
    %c0_i32_1 = arith.constant 0 : i32
    return %c0_i32, %c0_i32_0 : i32, i32
  }
  func.func @transform_5(%arg0: i32) -> (i32, i32) {
    %c0_i32 = arith.constant 0 : i32
    %c0_i32_0 = arith.constant 0 : i32
    %c0_i32_1 = arith.constant 0 : i32
    return %c0_i32, %c0_i32_0 : i32, i32
  }
  func.func @transform_6(%arg0: i32) -> (i32, i32) {
    %c0_i32 = arith.constant 0 : i32
    %c0_i32_0 = arith.constant 0 : i32
    %c0_i32_1 = arith.constant 0 : i32
    return %c0_i32, %c0_i32_0 : i32, i32
  }
  func.func @transform_7(%arg0: i32) -> (i32, i32) {
    %c0_i32 = arith.constant 0 : i32
    %c0_i32_0 = arith.constant 0 : i32
    %c0_i32_1 = arith.constant 0 : i32
    return %c0_i32, %c0_i32_0 : i32, i32
  }
  func.func @transform_8(%arg0: i32) -> (i32, i32) {
    %c0_i32 = arith.constant 0 : i32
    %c0_i32_0 = arith.constant 0 : i32
    %c0_i32_1 = arith.constant 0 : i32
    return %c0_i32, %c0_i32_0 : i32, i32
  }
  func.func @transform_9(%arg0: i32) -> (i32, i32) {
    %c0_i32 = arith.constant 0 : i32
    %c0_i32_0 = arith.constant 0 : i32
    %c0_i32_1 = arith.constant 0 : i32
    return %c0_i32, %c0_i32_0 : i32, i32
  }
  func.func @transform_10(%arg0: i32) -> (i32, i32) {
    %c0_i32 = arith.constant 0 : i32
    %c0_i32_0 = arith.constant 0 : i32
    %c0_i32_1 = arith.constant 0 : i32
    return %c0_i32, %c0_i32_0 : i32, i32
  }
  func.func @transform_11(%arg0: i32) -> (i32, i32) {
    %c0_i32 = arith.constant 0 : i32
    %c0_i32_0 = arith.constant 0 : i32
    %c0_i32_1 = arith.constant 0 : i32
    return %c0_i32, %c0_i32_0 : i32, i32
  }
  func.func @transform_12(%arg0: i32) -> (i32, i32) {
    %c0_i32 = arith.constant 0 : i32
    %c0_i32_0 = arith.constant 0 : i32
    %c0_i32_1 = arith.constant 0 : i32
    return %c0_i32, %c0_i32_0 : i32, i32
  }
  func.func @transform_13(%arg0: i32) -> (i32, i32) {
    %c0_i32 = arith.constant 0 : i32
    %c0_i32_0 = arith.constant 0 : i32
    %c0_i32_1 = arith.constant 0 : i32
    return %c0_i32, %c0_i32_0 : i32, i32
  }
  func.func @transform_14(%arg0: i32) -> (i32, i32) {
    %c0_i32 = arith.constant 0 : i32
    %c0_i32_0 = arith.constant 0 : i32
    %c0_i32_1 = arith.constant 0 : i32
    return %c0_i32, %c0_i32_0 : i32, i32
  }
  func.func @transform_15(%arg0: i32) -> (i32, i32) {
    %c0_i32 = arith.constant 0 : i32
    %c0_i32_0 = arith.constant 0 : i32
    %c0_i32_1 = arith.constant 0 : i32
    return %c0_i32, %c0_i32_0 : i32, i32
  }
  func.func @transform_16(%arg0: i32) -> (i32, i32) {
    %c0_i32 = arith.constant 0 : i32
    %c0_i32_0 = arith.constant 0 : i32
    %c0_i32_1 = arith.constant 0 : i32
    return %c0_i32, %c0_i32_0 : i32, i32
  }
  func.func @transform_17(%arg0: i32) -> (i32, i32) {
    %c0_i32 = arith.constant 0 : i32
    %c0_i32_0 = arith.constant 0 : i32
    %c0_i32_1 = arith.constant 0 : i32
    return %c0_i32, %c0_i32_0 : i32, i32
  }
  func.func @transform_18(%arg0: i32) -> (i32, i32) {
    %c0_i32 = arith.constant 0 : i32
    %c0_i32_0 = arith.constant 0 : i32
    %c0_i32_1 = arith.constant 0 : i32
    return %c0_i32, %c0_i32_0 : i32, i32
  }
  func.func @transform_19(%arg0: i32) -> (i32, i32, i32) {
    %c0_i32 = arith.constant 0 : i32
    %c0_i32_0 = arith.constant 0 : i32
    %c0_i32_1 = arith.constant 0 : i32
    return %arg0, %c0_i32, %c0_i32_0 : i32, i32, i32
  }
}

</mosaic_0001>

<bundles_post_ra>
// kernel: tpu_custom_call.1
= control target key start
LH: loop header
LB: loop body
LE: loop exit
PB: predicated region body
PF: predicated region fallthrough
CT: control target
= control target key end

     0   :  { %s5009_s0 = inlined_call_operand.vmem [shape: f32[2,2,128], index: 0, kind: input, shape index: {}]   ;;  %s5010_s1 = inlined_call_operand.vmem [shape: f32[2,4,128], index: 1, kind: input, shape index: {}]   ;;  %s5011_s2 = inlined_call_operand.vmem [shape: f32[4,16], index: 2, kind: input, shape index: {}]   ;;  %s5012_s3 = inlined_call_operand.vmem [shape: f32[64,2], index: 3, kind: input, shape index: {}]   ;;  %s5013_s4 = inlined_call_operand.vmem [shape: f32[64,1], index: 4, kind: input, shape index: {}]   ;;  %s5014_s5 = inlined_call_operand.vmem [shape: f32[128,64], index: 5, kind: input, shape index: {}]   ;;  %s5015_s6 = inlined_call_operand.vmem [shape: f32[128,1], index: 6, kind: input, shape index: {}]   ;;  %s5016_s7 = inlined_call_operand.vmem [shape: f32[256,128], index: 7, kind: input, shape index: {}]   ;;  %s5017_s8 = inlined_call_operand.vmem [shape: f32[256,1], index: 8, kind: input, shape index: {}]   ;;  %s5018_s9 = inlined_call_operand.vmem [shape: f32[16,256], index: 9, kind: input, shape index: {}]   ;;  %s5019_s10 = inlined_call_operand.vmem [shape: f32[16,1], index: 10, kind: input, shape index: {}]   ;;  %s5020_s11 = inlined_call_operand.vmem [shape: f32[64,2], index: 11, kind: input, shape index: {}]   ;;  %s5021_s12 = inlined_call_operand.vmem [shape: f32[64,1], index: 12, kind: input, shape index: {}]   ;;  %s5022_s13 = inlined_call_operand.vmem [shape: f32[128,64], index: 13, kind: input, shape index: {}]   ;;  %s5023_s14 = inlined_call_operand.vmem [shape: f32[128,1], index: 14, kind: input, shape index: {}]   ;;  %s5024_s15 = inlined_call_operand.vmem [shape: f32[256,128], index: 15, kind: input, shape index: {}]   ;;  %s5025_s16 = inlined_call_operand.vmem [shape: f32[256,1], index: 16, kind: input, shape index: {}]   ;;  %s5026_s17 = inlined_call_operand.vmem [shape: f32[16,256], index: 17, kind: input, shape index: {}]   ;;  %s5027_s18 = inlined_call_operand.vmem [shape: f32[16,1], index: 18, kind: input, shape index: {}]   ;;  %s5028_s19 = inlined_call_operand.hbm [shape: f32[2,4,128], index: 19, kind: output, shape index: {}]  }
   0x1   :  { %5033 = sst [smem:[#allocation31_spill]] %s5009_s0 }
   0x2   :  { %5034 = sst [smem:[#allocation32_spill]] %s5010_s1 }
   0x3   :  { %5035 = sst [smem:[#allocation33_spill]] %s5011_s2 }
   0x4   :  { %5036 = sst [smem:[#allocation34_spill]] %s5012_s3 }
   0x5   :  { %5037 = sst [smem:[#allocation35_spill]] %s5020_s11 }
   0x6   :  { %5038 = sst [smem:[#allocation36_spill]] %s5021_s12 }
   0x7   :  { %5039 = sst [smem:[#allocation37_spill]] %s5023_s14 }
   0x8   :  { %24 = vsyncpa [#allocation3], 0 }
   0x9   :  { %26 = vsyncpa [#allocation3 + $0x1], 0  ;;  %s3669_s0 = smov 0   ;;  %s3671_s30 = smov 0  }
   0xa   :  { %s3673_s20 = smov 0   ;;  %s3675_s21 = smov 0  }
   0xb LB: > { %5040 = sst [smem:[#allocation5_spill]] %s3558_s20  ;;  %s3690_s1 = sadd.s32 4294967295, %s3562_s21   ;;  %s3562_s21 = sphi %s3675_s21, %s5118_s21   ;;  %s3558_s20 = sphi %s3673_s20, %s5120_s20   ;;  %s3554_s30 = sphi %s3671_s30, %s5122_s30   ;;  %s3550_s0 = sphi %s3669_s0, %s5121_s0  }
   0xc   : > { %s2924_s22 = sadd.s32 4294967294, %s3562_s21   ;;  %s3694_s2 = sadd.s32 1, %s3562_s21  }
   0xd   : > { %5041 = sst [smem:[#allocation6_spill]] %s3694_s2  ;;  %s448_s23 = sadd.s32 1, %s3558_s20 }
   0xe   : > { %s445_s24 = ssub.s32 %s3562_s21, %s3694_s2  ;;  %p458_p0 = scmp.ne.s32.totalorder %s3558_s20, %s3554_s30 }
   0xf   : > { %p446_p1 = scmp.eq.s32.totalorder %s445_s24, 0  ;;  %p459_p2 = scmp.eq.s32.totalorder %s3690_s1, 1 }
  0x10   : > { %p464_p3 = scmp.ne.s32.totalorder %s3554_s30, %s3550_s0  ;;  %p465_p4 = scmp.eq.s32.totalorder %s2924_s22, 1 }
  0x11   : > { %s3705_s25 = scalar_select %p446_p1, %s3558_s20, %s448_s23  }
  0x12   : > { %p3707_p5 = por %p459_p2, %p458_p0  ;;  %p3711_p6 = por %p465_p4, %p464_p3 }
  0x13   : > { %5042 = sst [smem:[#allocation7_spill]] %s3705_s25  ;;  %p2927_p7 = scmp.ge.s32.totalorder %s3562_s21, 1 }
  0x14   : > { %p548_p8 = scmp.lt.s32.totalorder %s3562_s21, 3 }
  0x16   : > { %p549_p9 = pnand %p2927_p7, %p548_p8 }
  0x18   : > { %552 = sbr.rel (%p549_p9) target bundleno = 1749 (0x6d5), region = 96 }
  0x1d   : > { %s5045_s11 = sld [smem:[#allocation35_spill]]  ;;  %v3564_v2 = vmov 1   ;;  %v3565_v3 = vmov 0   ;;  %v793_v24 = vld [vmem:[%s5022_s13] sm:$0xff]  ;;  %vm905_vm0 = vcmask 523264   ;;  %v1178_v30 = vld [vmem:[%s5025_s16 + $0xf8] sm:$0xff]  ;;  %v665_v61 = vlaneseq }
  0x1e   : > { %3481 = vset.pattern.permute.xlu0 %v3564_v2  ;;  %3482 = vset.pattern.permute.xlu1 %v3565_v3  ;;  %s5046_s12 = sld [smem:[#allocation36_spill]]  ;;  %v1177_v32 = vld [vmem:[%s5025_s16 + $0xf0] sm:$0xff]  ;;  %v1176_v34 = vld [vmem:[%s5025_s16 + $0xe8] sm:$0xff]  ;;  %v1175_v36 = vld [vmem:[%s5025_s16 + $0xe0] sm:$0xff]  ;;  %p607_p10 = scmp.lt.s32.totalorder %s3690_s1, 1  ;;  %vm2751_vm1 = vcmask 1043456  }
  0x1f   : > { %s5047_s14 = sld [smem:[#allocation37_spill]]  ;;  %3207 = vmatprep.mubr.msk.f32.mxu1 %vm905_vm0, %v793_v24  ;;  %v1174_v38 = vld [vmem:[%s5025_s16 + $0xd8] sm:$0xff]  ;;  %v1173_v40 = vld [vmem:[%s5025_s16 + $0xd0] sm:$0xff]  ;;  %v1172_v42 = vld [vmem:[%s5025_s16 + $0xc8] sm:$0xff]  ;;  %vm3567_vm2 = vmmov 0   ;;  %vm2764_vm3 = vcmask 130048  }
  0x20   : > { %v1162_v41 = vld [vmem:[%s5025_s16 + $0x78] sm:$0xff]  ;;  %v1161_v43 = vld [vmem:[%s5025_s16 + $0x70] sm:$0xff]  ;;  %v1171_v44 = vld [vmem:[%s5025_s16 + $0xc0] sm:$0xff]  ;;  %s3899_s27 = scalar_select %p607_p10, %s3690_s1, 1 }
  0x21   : > { %v1160_v45 = vld [vmem:[%s5025_s16 + $0x68] sm:$0xff]  ;;  %v1170_v46 = vld [vmem:[%s5025_s16 + $0xb8] sm:$0xff]  ;;  %v1159_v47 = vld [vmem:[%s5025_s16 + $0x60] sm:$0xff]  ;;  %s5048_s23 = sld [smem:[#allocation34_spill]] }
  0x22   : > { %v1169_v48 = vld [vmem:[%s5025_s16 + $0xb0] sm:$0xff]  ;;  %v1158_v49 = vld [vmem:[%s5025_s16 + $0x58] sm:$0xff]  ;;  %v1168_v50 = vld [vmem:[%s5025_s16 + $0xa8] sm:$0xff]  ;;  %s2929_s22 = sshll.u32 %s3899_s27, 1  ;;  %s5049_s29 = sld [smem:[#allocation31_spill]] }
  0x23   : > { %v624_v0 = vld [vmem:[%s5045_s11 + $0x38] sm:$0xff]  ;;  %v623_v1 = vld [vmem:[%s5045_s11 + $0x30] sm:$0xff]  ;;  %v622_v4 = vld [vmem:[%s5045_s11 + $0x28] sm:$0xff] }
  0x24   : > { %706 = vperm.xlu0 %3481, %v624_v0   ;;  %657 = vperm.xlu1 %3482, %v623_v1   ;;  %v619_v5 = vld [vmem:[%s5045_s11 + $0x10] sm:$0xff]  ;;  %v618_v6 = vld [vmem:[%s5045_s11 + $0x8] sm:$0xff]  ;;  %v736_v7 = vld [vmem:[%s5046_s12 + $0x38] sm:$0xff] }
  0x25   : > { %v621_v8 = vld [vmem:[%s5045_s11 + $0x20] sm:$0xff]  ;;  %v735_v9 = vld [vmem:[%s5046_s12 + $0x30] sm:$0xff]  ;;  %v620_v10 = vld [vmem:[%s5045_s11 + $0x18] sm:$0xff] }
  0x26   : > { %v734_v11 = vld [vmem:[%s5046_s12 + $0x28] sm:$0xff]  ;;  %v617_v12 = vld [vmem:[%s5045_s11] sm:$0xff]  ;;  %v824_v15 = vld [vmem:[%s5047_s14 + $0x78] sm:$0xff]  ;;  %s5103_s11 = sld [smem:[#allocation32_spill]] }
  0x27   : > { %v730_v13 = vld [vmem:[%s5046_s12 + $0x8] sm:$0xff]  ;;  %v733_v14 = vld [vmem:[%s5046_s12 + $0x20] sm:$0xff]  ;;  %v732_v17 = vld [vmem:[%s5046_s12 + $0x18] sm:$0xff] }
  0x28   : > { %3483 = vset.pattern.permute.xlu1 %v3564_v2  ;;  %698 = vperm.xlu0 %3481, %v622_v4   ;;  %v822_v16 = vld [vmem:[%s5047_s14 + $0x68] sm:$0xff]  ;;  %v820_v18 = vld [vmem:[%s5047_s14 + $0x58] sm:$0xff]  ;;  %v731_v20 = vld [vmem:[%s5046_s12 + $0x10] sm:$0xff] }
  0x29   : > { %702 = vperm.xlu1 %3483, %v623_v1   ;;  %v818_v19 = vld [vmem:[%s5047_s14 + $0x48] sm:$0xff]  ;;  %v816_v21 = vld [vmem:[%s5047_s14 + $0x38] sm:$0xff]  ;;  %v729_v22 = vld [vmem:[%s5046_s12] sm:$0xff]  ;;  %s610_s12 = scalar_lea.vmem %s5049_s29, %s2929_s22  ;;  %s2930_s29 = sshll.u32 %s3899_s27, 2 }
  0x2a   : > { %v814_v23 = vld [vmem:[%s5047_s14 + $0x28] sm:$0xff]  ;;  %v823_v25 = vld [vmem:[%s5047_s14 + $0x70] sm:$0xff]  ;;  %v812_v26 = vld [vmem:[%s5047_s14 + $0x18] sm:$0xff]  ;;  %s604_s27 = sand.u32 1, %s3554_s30  }
  0x2b   : > { %v821_v27 = vld [vmem:[%s5047_s14 + $0x60] sm:$0xff]  ;;  %v810_v28 = vld [vmem:[%s5047_s14 + $0x8] sm:$0xff]  ;;  %v819_v29 = vld [vmem:[%s5047_s14 + $0x50] sm:$0xff]  ;;  %s2928_s2 = sshll.u32 %s604_s27, 2  ;;  %s2840_s25 = scalar_lea.sflag [#allocation3], %s604_s27 }
  0x2c   : > { %686 = vperm.xlu0 %3481, %v619_v5   ;;  %v817_v31 = vld [vmem:[%s5047_s14 + $0x40] sm:$0xff]  ;;  %v815_v33 = vld [vmem:[%s5047_s14 + $0x30] sm:$0xff]  ;;  %v1156_v53 = vld [vmem:[%s5025_s16 + $0x48] sm:$0xff]  ;;  %s614_s22 = scalar_lea.vmem %s5103_s11, %s2930_s29  ;;  %s606_s24 = scalar_lea.vmem [#allocation2], %s2928_s2 }
  0x2d   : > { %3484 = vset.pattern.permute.xlu1 %v3565_v3  ;;  %v813_v35 = vld [vmem:[%s5047_s14 + $0x20] sm:$0xff]  ;;  %v811_v37 = vld [vmem:[%s5047_s14 + $0x10] sm:$0xff]  ;;  %v1166_v54 = vld [vmem:[%s5025_s16 + $0x98] sm:$0xff]  ;;  %s2853_s28 = sshll.u32 %s606_s24, 4  ;;  %s4965_s28 = int_to_ptr.vmem [resolvable:$true] %s2853_s28 }
  0x2e   : > { %652 = vperm.xlu1 %3484, %v622_v4   ;;  %v809_v39 = vld [vmem:[%s5047_s14] sm:$0xff]  ;;  %v1157_v51 = vld [vmem:[%s5025_s16 + $0x50] sm:$0xff]  ;;  %v1154_v59 = vld [vmem:[%s5025_s16 + $0x38] sm:$0xff]  ;;  %v666_v4 = vshrl.u32 %v665_v61, 7  ;;  %s3502_s11 = scalar_lea.vmem %s4965_s28, 64 }
  0x2f   : > { %v1167_v52 = vld [vmem:[%s5025_s16 + $0xa0] sm:$0xff]  ;;  %v1165_v56 = vld [vmem:[%s5025_s16 + $0x90] sm:$0xff]  ;;  %v1164_v60 = vld [vmem:[%s5025_s16 + $0x88] sm:$0xff]  ;;  %p3503_p11 = scmp.ne.s32.totalorder %s4965_s28, %s3502_s11 }
  0x30   : > { %682 = vperm.xlu0 %3481, %v618_v6   ;;  %v1155_v55 = vld [vmem:[%s5025_s16 + $0x40] sm:$0xff]  ;;  %v3911_v1 = vld [vmem:[%s5048_s23 + $0x30] sm:$0xff] }
  0x31   : > { %v3949_v24 = vld [vmem:[%s5048_s23 + $0x10] sm:$0xff]  ;;  %p3504_p12 = pnand %p3503_p11, %p3707_p5 }
  0x32   : > { %774 = vperm.xlu1 %3484, %v736_v7  }
  0x33   : > { %p3505_p13 = pneg %p3504_p12 }
  0x34   : > { %3489 = vset.pattern.permute.xlu0 %v3565_v3 }
  0x35   : > { %662 = vperm.xlu0 %3489, %v624_v0   ;;  %v1153_v0 = vld [vmem:[%s5025_s16 + $0x30] sm:$0xff] }
  0x36   : > { %3485 = vset.pattern.permute.xlu1 %v3564_v2 }
  0x37   : > { %694 = vperm.xlu1 %3485, %v621_v8  }
  0x39   : > { %647 = vperm.xlu0 %3489, %v621_v8   ;;  %v1152_v8 = vld [vmem:[%s5025_s16 + $0x28] sm:$0xff] }
  0x3b   : > { %3486 = vset.pattern.permute.xlu1 %v3565_v3 }
  0x3c   : > { %769 = vperm.xlu1 %3486, %v735_v9   ;;  %v3925_v9 = vld [vmem:[%s5048_s23 + $0x28] sm:$0xff] }
  0x3d   : > { %642 = vperm.xlu0 %3489, %v620_v10  }
  0x40   : > { %3487 = vset.pattern.permute.xlu1 %v3564_v2 }
  0x41   : > { %690 = vperm.xlu1 %3487, %v620_v10   ;;  %764 = vperm.xlu0 %3489, %v734_v11   ;;  %v667_v10 = vsub.s32 0, %v666_v4 }
  0x45   : > { %3488 = vset.pattern.permute.xlu1 %v3565_v3  ;;  %627 = vperm.xlu0 %3489, %v617_v12  }
  0x46   : > { %637 = vperm.xlu1 %3488, %v619_v5  }
  0x49   : > { %744 = vperm.xlu0 %3489, %v730_v13  }
  0x4a   : > { %759 = vperm.xlu1 %3488, %v733_v14  }
  0x4d   : > { %902 = vperm.xlu0 %3489, %v824_v15   ;;  %v1151_v15 = vld [vmem:[%s5025_s16 + $0x20] sm:$0xff] }
  0x4e   : > { %632 = vperm.xlu1 %3488, %v618_v6   ;;  %v711_v6 = vsub.s32 1, %v666_v4 }
  0x51   : > { %892 = vperm.xlu0 %3489, %v822_v16   ;;  %v1798_v16 = vld [vmem:[%s5013_s4 + $0x38] sm:$0xff] }
  0x52   : > { %754 = vperm.xlu1 %3488, %v732_v17  }
  0x55   : > { %882 = vperm.xlu0 %3489, %v820_v18  }
  0x56   : > { %3490 = vset.pattern.permute.xlu1 %v3564_v2 }
  0x57   : > { %678 = vperm.xlu1 %3490, %v617_v12   ;;  %v615_v12 = vld [vmem:[%s610_s12] sm:$0x3]  ;;  %s2965_s12 = sshll.u32 %s3690_s1, 6  ;;  %s3568_s1 = smov [#allocation2]  }
  0x58   : > { %v3929_v13 = vrot.slane %v615_v12, %v711_v6  ;;  %v3938_v17 = vrot.slane %v615_v12, %v667_v10  ;;  %s4970_s20 = scalar_lea.hbm %s5028_s19, %s2965_s12 }
  0x59   : > { %872 = vperm.xlu0 %3489, %v818_v19  }
  0x5b   : > { %3491 = vset.pattern.permute.xlu1 %v3565_v3 }
  0x5c   : > { %749 = vperm.xlu1 %3491, %v731_v20  }
  0x5d   : > { %862 = vperm.xlu0 %3489, %v816_v21   ;;  %v1150_v21 = vld [vmem:[%s5025_s16 + $0x18] sm:$0xff] }
  0x60   : > { %739 = vperm.xlu1 %3491, %v729_v22  }
  0x61   : > { %852 = vperm.xlu0 %3489, %v814_v23  }
  0x64   : > { %897 = vperm.xlu1 %3491, %v823_v25  }
  0x65   : > { %842 = vperm.xlu0 %3489, %v812_v26  }
  0x68   : > { %887 = vperm.xlu1 %3491, %v821_v27  }
  0x69   : > { %832 = vperm.xlu0 %3489, %v810_v28   ;;  %v1149_v28 = vld [vmem:[%s5025_s16 + $0x10] sm:$0xff] }
  0x6c   : > { %877 = vperm.xlu1 %3491, %v819_v29  }
  0x6d   : > { %1336 = vperm.xlu0 %3489, %v1178_v30  }
  0x70   : > { %867 = vperm.xlu1 %3491, %v817_v31   ;;  %v3959_v31 = vld [vmem:[%s5048_s23 + $0x8] sm:$0xff] }
  0x71   : > { %1331 = vperm.xlu0 %3489, %v1177_v32  }
  0x74   : > { %857 = vperm.xlu1 %3491, %v815_v33  }
  0x75   : > { %1326 = vperm.xlu0 %3489, %v1176_v34  }
  0x78   : > { %847 = vperm.xlu1 %3491, %v813_v35  }
  0x79   : > { %1321 = vperm.xlu0 %3489, %v1175_v36  }
  0x7c   : > { %837 = vperm.xlu1 %3491, %v811_v37  }
  0x7d   : > { %1316 = vperm.xlu0 %3489, %v1174_v38   ;;  %v1694_v38 = vld [vmem:[%s5048_s23 + $0x38] sm:$0xff] }
  0x80   : > { %827 = vperm.xlu1 %3491, %v809_v39  }
  0x81   : > { %1311 = vperm.xlu0 %3489, %v1173_v40   ;;  %v1794_v40 = vld [vmem:[%s5013_s4 + $0x18] sm:$0xff] }
  0x84   : > { %1256 = vperm.xlu1 %3491, %v1162_v41  }
  0x85   : > { %1306 = vperm.xlu0 %3489, %v1172_v42  }
  0x88   : > { %1251 = vperm.xlu1 %3491, %v1161_v43  }
  0x89   : > { %1301 = vperm.xlu0 %3489, %v1171_v44  }
  0x8c   : > { %1246 = vperm.xlu1 %3491, %v1160_v45   ;;  %v1148_v45 = vld [vmem:[%s5025_s16 + $0x8] sm:$0xff] }
  0x8d   : > { %1296 = vperm.xlu0 %3489, %v1170_v46  }
  0x90   : > { %1241 = vperm.xlu1 %3491, %v1159_v47  }
  0x91   : > { %1291 = vperm.xlu0 %3489, %v1169_v48  }
  0x94   : > { %1236 = vperm.xlu1 %3491, %v1158_v49   ;;  %v1163_v49 = vld [vmem:[%s5025_s16 + $0x80] sm:$0xff] }
  0x95   : > { %1286 = vperm.xlu0 %3489, %v1168_v50  }
  0x98   : > { %1231 = vperm.xlu1 %3491, %v1157_v51  }
  0x99   : > { %1281 = vperm.xlu0 %3489, %v1167_v52  }
  0x9c   : > { %1226 = vperm.xlu1 %3491, %v1156_v53   ;;  %v1691_v53 = vld [vmem:[%s5048_s23 + $0x20] sm:$0xff] }
  0x9d   : > { %1276 = vperm.xlu0 %3489, %v1166_v54  }
  0x9f   : > { %v658_v57 = vpop.permute.xlu1 %657  ;;  %v707_v58 = vpop.permute.xlu0 %706 }
  0xa0   : > { %1221 = vperm.xlu1 %3491, %v1155_v55   ;;  %v720_v18 = vmul.f32 %v3929_v13, %v707_v58  ;;  %v675_v26 = vmul.f32 %v3938_v17, %v658_v57  ;;  %v1690_v55 = vld [vmem:[%s5048_s23 + $0x18] sm:$0xff] }
  0xa1   : > { %1271 = vperm.xlu0 %3489, %v1165_v56  }
  0xa3   : > { %v699_v62 = vpop.permute.xlu0 %698 }
  0xa4   : > { %v703_v63 = vpop.permute.xlu1 %702  ;;  %1216 = vperm.xlu1 %3491, %v1154_v59   ;;  %v718_v32 = vmul.f32 %v3929_v13, %v699_v62 }
  0xa5   : > { %1266 = vperm.xlu0 %3489, %v1164_v60   ;;  %v719_v22 = vmul.f32 %v3929_v13, %v703_v63  ;;  %v1147_v60 = vld [vmem:[%s5025_s16] sm:$0xff] }
  0xa6   : > { %v3996_v63 = vld [vmem:[%s5048_s23] sm:$0xff] }
  0xa7   : > { %v3913_v5 = vpop.permute.xlu0 %686  ;;  %v727_v30 = vadd.f32 %v719_v22, %v675_v26 }
  0xa8   : > { %1211 = vperm.xlu1 %3491, %v1153_v0   ;;  %v715_v12 = vmul.f32 %v3929_v13, %v3913_v5 }
  0xa9   : > { %v653_v7 = vpop.permute.xlu1 %652  ;;  %1727 = vperm.xlu0 %3489, %v3911_v1  }
  0xaa   : > { %v674_v33 = vmul.f32 %v3938_v17, %v653_v7 }
  0xab   : > { %v3927_v11 = vpop.permute.xlu0 %682 }
  0xac   : > { %1206 = vperm.xlu1 %3491, %v1152_v8   ;;  %v726_v41 = vadd.f32 %v718_v32, %v674_v33  ;;  %v714_v7 = vmul.f32 %v3929_v13, %v3927_v11  ;;  %v796_v32 = vld [vmem:[%s5022_s13 + $0x18] sm:$0xff]  ;;  %v797_v33 = vld [vmem:[%s5022_s13 + $0x20] sm:$0xff] }
  0xad   : > { %v775_v14 = vpop.permute.xlu1 %774  ;;  %1722 = vperm.xlu0 %3489, %v3925_v9  }
  0xb0   : > { %v663_v19 = vpop.permute.xlu0 %662  ;;  %1201 = vperm.xlu1 %3491, %v1151_v15  }
  0xb1   : > { %v676_v20 = vmul.f32 %v3938_v17, %v663_v19  ;;  %1836 = vperm.xlu0 %3489, %v1798_v16  }
  0xb2   : > { %v695_v23 = vpop.permute.xlu1 %694 }
  0xb3   : > { %v728_v25 = vadd.f32 %v720_v18, %v676_v20  ;;  %v717_v50 = vmul.f32 %v3929_v13, %v695_v23 }
  0xb4   : > { %v648_v27 = vpop.permute.xlu0 %647  ;;  %1196 = vperm.xlu1 %3491, %v1150_v21  }
  0xb5   : > { %1707 = vperm.xlu0 %3489, %v3949_v24   ;;  %v784_v29 = vadd.f32 %v775_v14, %v728_v25  ;;  %v673_v47 = vmul.f32 %v3938_v17, %v648_v27 }
  0xb7   : > { %v770_v34 = vpop.permute.xlu1 %769  ;;  %v792_v35 = vmax.f32 %v784_v29, 0.0  ;;  %v725_v51 = vadd.f32 %v717_v50, %v673_v47  ;;  %v795_v29 = vld [vmem:[%s5022_s13 + $0x10] sm:$0xff] }
  0xb8   : > { %v783_v36 = vadd.f32 %v770_v34, %v727_v30  ;;  %v643_v37 = vpop.permute.xlu0 %642  ;;  %1191 = vperm.xlu1 %3491, %v1149_v28   ;;  %v794_v28 = vld [vmem:[%s5022_s13 + $0x8] sm:$0xff]  ;;  %v1885_v47 = vld [vmem:[%s5015_s6 + $0x70] sm:$0xff] }
  0xb9   : > { %1702 = vperm.xlu0 %3489, %v3959_v31   ;;  %3191 = vmatprep.subr.mxu1 %v792_v35  ;;  %v672_v56 = vmul.f32 %v3938_v17, %v643_v37  ;;  %v1796_v30 = vld [vmem:[%s5013_s4 + $0x28] sm:$0xff]  ;;  %v800_v37 = vld [vmem:[%s5022_s13 + $0x38] sm:$0xff] }
  0xba   : > { %v791_v39 = vmax.f32 %v783_v36, 0.0  ;;  %3192 = vmatpush3.msra.mxu1 %v792_v35  ;;  %v798_v34 = vld [vmem:[%s5022_s13 + $0x28] sm:$0xff]  ;;  %v799_v35 = vld [vmem:[%s5022_s13 + $0x30] sm:$0xff]  ;;  %v1795_v36 = vld [vmem:[%s5013_s4 + $0x20] sm:$0xff] }
  0xbc   : > { %v691_v42 = vpop.permute.xlu1 %690  ;;  %v765_v43 = vpop.permute.xlu0 %764  ;;  %1732 = vperm.xlu1 %3491, %v1694_v38   ;;  %3193 = vmatprep.subr.mxu1 %v791_v39 }
  0xbd   : > { %v782_v44 = vadd.f32 %v765_v43, %v726_v41  ;;  %1816 = vperm.xlu0 %3489, %v1794_v40   ;;  %3194 = vmatpush3.msra.mxu1 %v791_v39  ;;  %v716_v57 = vmul.f32 %v3929_v13, %v691_v42  ;;  %v803_v39 = vld [vmem:[%s5022_s13 + $0x50] sm:$0xff]  ;;  %v804_v40 = vld [vmem:[%s5022_s13 + $0x58] sm:$0xff]  ;;  %v805_v41 = vld [vmem:[%s5022_s13 + $0x60] sm:$0xff] }
  0xbe   : > { %v1793_v42 = vld [vmem:[%s5013_s4 + $0x10] sm:$0xff]  ;;  %v1792_v43 = vld [vmem:[%s5013_s4 + $0x8] sm:$0xff] }
  0xbf   : > { %v790_v46 = vmax.f32 %v782_v44, 0.0  ;;  %v724_v61 = vadd.f32 %v716_v57, %v672_v56  ;;  %v1115_v44 = vld [vmem:[%s5024_s15] sm:$0xff]  ;;  %v1880_v57 = vld [vmem:[%s5015_s6 + $0x48] sm:$0xff] }
  0xc0   : > { %1186 = vperm.xlu1 %3491, %v1148_v45   ;;  %v628_v6 = vpop.permute.xlu0 %627  ;;  %v1886_v45 = vld [vmem:[%s5015_s6 + $0x78] sm:$0xff] }
  0xc1   : > { %v638_v48 = vpop.permute.xlu1 %637  ;;  %3499 = vset.pattern.permute.xlu0 %v3564_v2  ;;  %3195 = vmatprep.subr.mxu1 %v790_v46  ;;  %v669_v19 = vmul.f32 %v3938_v17, %v628_v6  ;;  %v1876_v6 = vld [vmem:[%s5015_s6 + $0x28] sm:$0xff] }
  0xc2   : > { %1772 = vperm.xlu0 %3499, %v1694_v38   ;;  %3196 = vmatpush3.msra.mxu1 %v790_v46  ;;  %v671_v8 = vmul.f32 %v3938_v17, %v638_v48  ;;  %v801_v38 = vld [vmem:[%s5022_s13 + $0x40] sm:$0xff] }
  0xc3   : > { %v1791_v46 = vld [vmem:[%s5013_s4] sm:$0xff] }
  0xc4   : > { %1261 = vperm.xlu1 %3491, %v1163_v49   ;;  %v723_v16 = vadd.f32 %v715_v12, %v671_v8  ;;  %v745_v18 = vpop.permute.xlu0 %744  ;;  %v1884_v49 = vld [vmem:[%s5015_s6 + $0x68] sm:$0xff] }
  0xc5   : > { %v760_v52 = vpop.permute.xlu1 %759 }
  0xc6   : > { %v781_v54 = vadd.f32 %v760_v52, %v725_v51  ;;  %1760 = vperm.xlu0 %3499, %v1691_v53   ;;  %v1883_v51 = vld [vmem:[%s5015_s6 + $0x60] sm:$0xff] }
  0xc8   : > { %v789_v58 = vmax.f32 %v781_v54, 0.0  ;;  %3492 = vset.pattern.permute.xlu1 %v3564_v2 }
  0xc9   : > { %v633_v59 = vpop.permute.xlu1 %632  ;;  %1768 = vperm.xlu1 %3492, %v3911_v1  }
  0xca   : > { %3197 = vmatprep.subr.mxu1 %v789_v58  ;;  %1756 = vperm.xlu0 %3499, %v1690_v55   ;;  %v670_v1 = vmul.f32 %v3938_v17, %v633_v59  ;;  %v1879_v59 = vld [vmem:[%s5015_s6 + $0x40] sm:$0xff] }
  0xcb   : > { %3198 = vmatpush3.msra.mxu1 %v789_v58 }
  0xcc   : > { %v722_v14 = vadd.f32 %v714_v7, %v670_v1  ;;  %v1877_v1 = vld [vmem:[%s5015_s6 + $0x30] sm:$0xff] }
  0xcd   : > { %v755_v62 = vpop.permute.xlu1 %754  ;;  %3493 = vset.pattern.permute.xlu1 %v3565_v3 }
  0xce   : > { %v780_v0 = vadd.f32 %v755_v62, %v724_v61  ;;  %1181 = vperm.xlu1 %3493, %v1147_v60   ;;  %1744 = vperm.xlu0 %3499, %v3996_v63   ;;  %v778_v21 = vadd.f32 %v745_v18, %v722_v14  ;;  %v903_v60 = vpop.permute.xlu0 %902  ;;  %v1878_v62 = vld [vmem:[%s5015_s6 + $0x38] sm:$0xff]  ;;  %v1873_v18 = vld [vmem:[%s5015_s6 + $0x10] sm:$0xff] }
  0xd0   : > { %v788_v4 = vmax.f32 %v780_v0, 0.0  ;;  %v786_v26 = vmax.f32 %v778_v21, 0.0 }
  0xd2   : > { %3494 = vset.pattern.permute.xlu1 %v3564_v2  ;;  %v679_v10 = vpop.permute.xlu1 %678  ;;  %3199 = vmatprep.subr.mxu1 %v788_v4  ;;  %v893_v7 = vpop.permute.xlu0 %892 }
  0xd3   : > { %1764 = vperm.xlu1 %3494, %v3925_v9   ;;  %3200 = vmatpush3.msra.mxu1 %v788_v4  ;;  %v713_v15 = vmul.f32 %v3929_v13, %v679_v10  ;;  %v1797_v9 = vld [vmem:[%s5013_s4 + $0x30] sm:$0xff]  ;;  %v1875_v10 = vld [vmem:[%s5015_s6 + $0x20] sm:$0xff] }
  0xd4   : > { %3501 = vset.pattern.permute.xlu0 %v3565_v3 }
  0xd5   : > { %v721_v22 = vadd.f32 %v713_v15, %v669_v19  ;;  %1801 = vperm.xlu0 %3501, %v1791_v46   ;;  %v1874_v15 = vld [vmem:[%s5015_s6 + $0x18] sm:$0xff] }
  0xd7   : > { %3495 = vset.pattern.permute.xlu1 %v3565_v3  ;;  %v750_v11 = vpop.permute.xlu1 %749 }
  0xd8   : > { %v779_v20 = vadd.f32 %v750_v11, %v723_v16  ;;  %1717 = vperm.xlu1 %3495, %v1691_v53   ;;  %v1882_v53 = vld [vmem:[%s5015_s6 + $0x58] sm:$0xff]  ;;  %v883_v11 = vpop.permute.xlu0 %882 }
  0xd9   : > { %1954 = vperm.xlu0 %3501, %v1884_v49  }
  0xda   : > { %v787_v5 = vmax.f32 %v779_v20, 0.0  ;;  %v1872_v20 = vld [vmem:[%s5015_s6 + $0x8] sm:$0xff] }
  0xdb   : > { %v740_v23 = vpop.permute.xlu1 %739 }
  0xdc   : > { %v777_v25 = vadd.f32 %v740_v23, %v721_v22  ;;  %1831 = vperm.xlu1 %3495, %v1797_v9   ;;  %3201 = vmatprep.subr.mxu1 %v787_v5  ;;  %v2239_v23 = vld [vmem:[%s5017_s8 + $0xf8] sm:$0xff] }
  0xdd   : > { %3202 = vmatpush3.msra.mxu1 %v787_v5  ;;  %1944 = vperm.xlu0 %3501, %v1882_v53   ;;  %v1871_v5 = vld [vmem:[%s5015_s6] sm:$0xff] }
  0xde   : > { %v785_v27 = vmax.f32 %v777_v25, 0.0  ;;  %3203 = vmatprep.subr.mxu1 %v786_v26  ;;  %v2220_v53 = vld [vmem:[%s5017_s8 + $0x60] sm:$0xff] }
  0xdf   : > { %3204 = vmatpush3.msra.mxu1 %v786_v26  ;;  %v873_v26 = vpop.permute.xlu0 %872 }
  0xe0   : > { %1712 = vperm.xlu1 %3495, %v1690_v55   ;;  %3205 = vmatprep.subr.mxu1 %v785_v27  ;;  %v1881_v55 = vld [vmem:[%s5015_s6 + $0x50] sm:$0xff] }
  0xe1   : > { %3206 = vmatpush3.msra.mxu1 %v785_v27  ;;  %1934 = vperm.xlu0 %3501, %v1880_v57   ;;  %v2235_v57 = vld [vmem:[%s5017_s8 + $0xd8] sm:$0xff] }
  0xe2   : > { %3208 = vmatmul.mubr.msk.f32.vlgmr.msra.gmra.mxu1 %vm905_vm0, %v794_v28 }
  0xe3   : > { %3210 = vmatprep.mubr.msk.f32.mxu1 %vm905_vm0, %v795_v29 }
  0xe4   : > { %1826 = vperm.xlu1 %3495, %v1796_v30  }
  0xe5   : > { %1924 = vperm.xlu0 %3501, %v1878_v62  }
  0xe6   : > { %3211 = vmatmul.mubr.msk.f32.gmra.mxu1 %vm905_vm0, %v796_v32  ;;  %v2223_v32 = vld [vmem:[%s5017_s8 + $0x78] sm:$0xff] }
  0xe7   : > { %3213 = vmatprep.mubr.msk.f32.mxu1 %vm905_vm0, %v797_v33 }
  0xe8   : > { %3496 = vset.pattern.permute.xlu1 %v3564_v2 }
  0xe9   : > { %1752 = vperm.xlu1 %3496, %v3949_v24   ;;  %v802_v24 = vld [vmem:[%s5022_s13 + $0x48] sm:$0xff]  ;;  %1914 = vperm.xlu0 %3501, %v1876_v6  }
  0xea   : > { %3214 = vmatmul.mubr.msk.f32.gmra.mxu1 %vm905_vm0, %v798_v34  ;;  %v2238_v34 = vld [vmem:[%s5017_s8 + $0xf0] sm:$0xff] }
  0xeb   : > { %3216 = vmatprep.mubr.msk.f32.mxu1 %vm905_vm0, %v799_v35 }
  0xed   : > { %3497 = vset.pattern.permute.xlu1 %v3565_v3  ;;  %1904 = vperm.xlu0 %3501, %v1874_v15  }
  0xee   : > { %1821 = vperm.xlu1 %3497, %v1795_v36   ;;  %3217 = vmatmul.mubr.msk.f32.gmra.mxu1 %vm905_vm0, %v800_v37 }
  0xef   : > { %3219 = vmatprep.mubr.msk.f32.mxu1 %vm905_vm0, %v801_v38 }
  0xf1   : > { %1894 = vperm.xlu0 %3501, %v1872_v20  }
  0xf2   : > { %3498 = vset.pattern.permute.xlu1 %v3564_v2  ;;  %3220 = vmatmul.mubr.msk.f32.gmra.mxu1 %vm905_vm0, %v802_v24  ;;  %v806_v2 = vld [vmem:[%s5022_s13 + $0x68] sm:$0xff]  ;;  %v2222_v24 = vld [vmem:[%s5017_s8 + $0x70] sm:$0xff] }
  0xf3   : > { %1748 = vperm.xlu1 %3498, %v3959_v31   ;;  %3222 = vmatprep.mubr.msk.f32.mxu1 %vm905_vm0, %v803_v39  ;;  %v807_v31 = vld [vmem:[%s5022_s13 + $0x70] sm:$0xff]  ;;  %v863_v39 = vpop.permute.xlu0 %862 }
  0xf5   : > { %2397 = vperm.xlu0 %3501, %v2239_v23   ;;  %v1117_v23 = vld [vmem:[%s5024_s15 + $0x10] sm:$0xff] }
  0xf6   : > { %3223 = vmatmul.mubr.msk.f32.gmra.mxu1 %vm905_vm0, %v804_v40  ;;  %v2237_v40 = vld [vmem:[%s5017_s8 + $0xe8] sm:$0xff] }
  0xf7   : > { %3500 = vset.pattern.permute.xlu1 %v3565_v3  ;;  %3225 = vmatprep.mubr.msk.f32.mxu1 %vm905_vm0, %v805_v41  ;;  %v808_v3 = vld [vmem:[%s5022_s13 + $0x78] sm:$0xff] }
  0xf8   : > { %1697 = vperm.xlu1 %3500, %v3996_v63   ;;  %v898_v63 = vpop.permute.xlu1 %897 }
  0xf9   : > { %2392 = vperm.xlu0 %3501, %v2238_v34   ;;  %v1121_v34 = vld [vmem:[%s5024_s15 + $0x30] sm:$0xff] }
  0xfa   : > { %3226 = vmatmul.mubr.msk.f32.gmra.mxu1 %vm905_vm0, %v806_v2 }
  0xfb   : > { %3228 = vmatprep.mubr.msk.f32.mxu1 %vm905_vm0, %v807_v31 }
  0xfc   : > { %1811 = vperm.xlu1 %3500, %v1793_v42   ;;  %v888_v12 = vpop.permute.xlu1 %887 }
  0xfd   : > { %2387 = vperm.xlu0 %3501, %v2237_v40   ;;  %v2227_v40 = vld [vmem:[%s5017_s8 + $0x98] sm:$0xff] }
  0xfe   : > { %3229 = vmatmul.mubr.msk.f32.gmra.mxu1 %vm905_vm0, %v808_v3 }
  0xff   : > { %3263 = vmatprep.mubr.f32.mxu1 %v1115_v44  ;;  %v2236_v44 = vld [vmem:[%s5017_s8 + $0xe0] sm:$0xff] }
 0x100   : > { %1806 = vperm.xlu1 %3500, %v1792_v43   ;;  %v878_v21 = vpop.permute.xlu1 %877  ;;  %v2221_v43 = vld [vmem:[%s5017_s8 + $0x68] sm:$0xff] }
 0x101   : > { %2382 = vperm.xlu0 %3501, %v2236_v44   ;;  %v1127_v44 = vld [vmem:[%s5024_s15 + $0x60] sm:$0xff] }
 0x104   : > { %1964 = vperm.xlu1 %3500, %v1886_v45   ;;  %v868_v33 = vpop.permute.xlu1 %867 }
 0x105   : > { %2377 = vperm.xlu0 %3501, %v2235_v57   ;;  %v1130_v57 = vld [vmem:[%s5024_s15 + $0x78] sm:$0xff] }
 0x108   : > { %1959 = vperm.xlu1 %3500, %v1885_v47   ;;  %v858_v31 = vpop.permute.xlu1 %857  ;;  %v853_v47 = vpop.permute.xlu0 %852 }
 0x10c   : > { %1949 = vperm.xlu1 %3500, %v1883_v51  }
 0x110   : > { %1939 = vperm.xlu1 %3500, %v1881_v55   ;;  %v848_v55 = vpop.permute.xlu1 %847 }
 0x114   : > { %1929 = vperm.xlu1 %3500, %v1879_v59  }
 0x118   : > { %1919 = vperm.xlu1 %3500, %v1877_v1   ;;  %v843_v1 = vpop.permute.xlu0 %842 }
 0x11c   : > { %1909 = vperm.xlu1 %3500, %v1875_v10   ;;  %v2218_v10 = vld [vmem:[%s5017_s8 + $0x50] sm:$0xff]  ;;  %v833_v15 = vpop.permute.xlu0 %832 }
 0x120   : > { %1899 = vperm.xlu1 %3500, %v1873_v18   ;;  %v2217_v18 = vld [vmem:[%s5017_s8 + $0x48] sm:$0xff] }
 0x124   : > { %1889 = vperm.xlu1 %3500, %v1871_v5  }
 0x128   : > { %2317 = vperm.xlu1 %3500, %v2223_v32   ;;  %v2229_v32 = vld [vmem:[%s5017_s8 + $0xa8] sm:$0xff] }
 0x12c   : > { %2312 = vperm.xlu1 %3500, %v2222_v24   ;;  %v1123_v24 = vld [vmem:[%s5024_s15 + $0x40] sm:$0xff] }
 0x130   : > { %2307 = vperm.xlu1 %3500, %v2221_v43   ;;  %v1126_v43 = vld [vmem:[%s5024_s15 + $0x58] sm:$0xff] }
 0x134   : > { %2302 = vperm.xlu1 %3500, %v2220_v53   ;;  %v2209_v53 = vld [vmem:[%s5017_s8 + $0x8] sm:$0xff] }
 0x1a2   : > { %v4105_v48 = vpop.f32.mrf.mxu1 }
 0x1a4   : > { %v4110_v50 = vpop.f32.mrf.mxu1 }
 0x1a6   : > { %v4115_v52 = vpop.f32.mrf.mxu1 }
 0x1a8   : > { %v4120_v54 = vpop.f32.mrf.mxu1 }
 0x1aa   : > { %v4125_v56 = vpop.f32.mrf.mxu1 }
 0x1ac   : > { %v4130_v58 = vpop.f32.mrf.mxu1 }
 0x1ae   : > { %v4135_v61 = vpop.f32.mrf.mxu1 }
 0x1af   : > { %v1056_v49 = vadd.f32 %v4135_v61, %v863_v39  ;;  %v1046_v61 = vadd.f32 %v4125_v56, %v853_v47  ;;  %v1036_v56 = vadd.f32 %v4115_v52, %v843_v1  ;;  %v1026_v52 = vadd.f32 %v4105_v48, %v833_v15  ;;  %v2212_v39 = vld [vmem:[%s5017_s8 + $0x20] sm:$0xff]  ;;  %v4333_v1 = vpop.permute.xlu0 %1336  ;;  %v1141_v15 = vld [vmem:[%s5024_s15 + $0xd0] sm:$0xff] }
 0x1b0   : > { %v4140_v0 = vpop.f32.mrf.mxu1 }
 0x1b1   : > { %v1051_v59 = vadd.f32 %v4140_v0, %v858_v31  ;;  %v1106_v62 = vmax.f32 %v1056_v49, 0.0  ;;  %v1041_v0 = vadd.f32 %v4130_v58, %v848_v55  ;;  %v1100_v48 = vmax.f32 %v1026_v52, 0.0  ;;  %v2211_v31 = vld [vmem:[%s5017_s8 + $0x18] sm:$0xff]  ;;  %v1128_v49 = vld [vmem:[%s5024_s15 + $0x68] sm:$0xff]  ;;  %v2224_v55 = vld [vmem:[%s5017_s8 + $0x80] sm:$0xff] }
 0x1b2   : > { %v3221_v4 = vpop.f32.mrf.mxu1  ;;  %v1142_v52 = vld [vmem:[%s5024_s15 + $0xd8] sm:$0xff] }
 0x1b3   : > { %v1066_v42 = vadd.f32 %v3221_v4, %v873_v26  ;;  %v2234_v4 = vld [vmem:[%s5017_s8 + $0xd0] sm:$0xff]  ;;  %v1105_v6 = vmax.f32 %v1051_v59, 0.0  ;;  %v1131_v59 = vld [vmem:[%s5024_s15 + $0x80] sm:$0xff] }
 0x1b4   : > { %v1060_v8 = vpop.f32.mrf.mxu1  ;;  %2372 = vperm.xlu0 %3501, %v2234_v4   ;;  %v2230_v26 = vld [vmem:[%s5017_s8 + $0xb0] sm:$0xff] }
 0x1b5   : > { %v1061_v45 = vadd.f32 %v1060_v8, %v868_v33  ;;  %v1108_v51 = vmax.f32 %v1066_v42, 0.0  ;;  %v1104_v8 = vmax.f32 %v1046_v61, 0.0  ;;  %v1120_v33 = vld [vmem:[%s5024_s15 + $0x28] sm:$0xff]  ;;  %v1133_v4 = vld [vmem:[%s5024_s15 + $0x90] sm:$0xff] }
 0x1b6   : > { %v3224_v14 = vpop.f32.mrf.mxu1 }
 0x1b7   : > { %v1076_v37 = vadd.f32 %v3224_v14, %v883_v11  ;;  %v1103_v14 = vmax.f32 %v1041_v0, 0.0  ;;  %v1600_v0 = vld [vmem:[%s5027_s18] sm:$0xff] }
 0x1b8   : > { %v1070_v16 = vpop.f32.mrf.mxu1 }
 0x1b9   : > { %v1071_v41 = vadd.f32 %v1070_v16, %v878_v21  ;;  %v1110_v3 = vmax.f32 %v1076_v37, 0.0  ;;  %v1102_v16 = vmax.f32 %v1036_v56, 0.0  ;;  %v2216_v21 = vld [vmem:[%s5017_s8 + $0x40] sm:$0xff] }
 0x1ba   : > { %v3227_v19 = vpop.f32.mrf.mxu1  ;;  %v1135_v56 = vld [vmem:[%s5024_s15 + $0xa0] sm:$0xff] }
 0x1bb   : > { %v1086_v28 = vadd.f32 %v3227_v19, %v893_v7  ;;  %v1109_v46 = vmax.f32 %v1071_v41, 0.0  ;;  %v838_v7 = vpop.permute.xlu1 %837  ;;  %v1124_v41 = vld [vmem:[%s5024_s15 + $0x48] sm:$0xff] }
 0x1bc   : > { %v1080_v9 = vpop.f32.mrf.mxu1  ;;  %v1031_v58 = vadd.f32 %v4120_v54, %v838_v7  ;;  %v2232_v54 = vld [vmem:[%s5017_s8 + $0xc0] sm:$0xff]  ;;  %v1134_v7 = vld [vmem:[%s5024_s15 + $0x98] sm:$0xff] }
 0x1bd   : > { %v1081_v35 = vadd.f32 %v1080_v9, %v888_v12  ;;  %v1112_v38 = vmax.f32 %v1086_v28, 0.0  ;;  %v2233_v12 = vld [vmem:[%s5017_s8 + $0xc8] sm:$0xff]  ;;  %v2231_v9 = vld [vmem:[%s5017_s8 + $0xb8] sm:$0xff]  ;;  %v1119_v28 = vld [vmem:[%s5024_s15 + $0x20] sm:$0xff] }
 0x1be   : > { %v3230_v22 = vpop.f32.mrf.mxu1  ;;  %2367 = vperm.xlu0 %3501, %v2233_v12   ;;  %v1101_v20 = vmax.f32 %v1031_v58, 0.0  ;;  %v1138_v12 = vld [vmem:[%s5024_s15 + $0xb8] sm:$0xff]  ;;  %v1139_v58 = vld [vmem:[%s5024_s15 + $0xc0] sm:$0xff] }
 0x1bf   : > { %v1096_v25 = vadd.f32 %v3230_v22, %v903_v60  ;;  %v1111_v2 = vmax.f32 %v1081_v35, 0.0  ;;  %v1107_v60 = vmax.f32 %v1061_v45, 0.0  ;;  %v828_v11 = vpop.permute.xlu1 %827  ;;  %v2213_v35 = vld [vmem:[%s5017_s8 + $0x28] sm:$0xff]  ;;  %v2210_v45 = vld [vmem:[%s5017_s8 + $0x10] sm:$0xff] }
 0x1c0   : > { %v1090_v27 = vpop.f32.mrf.mxu1  ;;  %v1021_v19 = vadd.f32 %v4110_v50, %v828_v11  ;;  %v1116_v50 = vld [vmem:[%s5024_s15 + $0x8] sm:$0xff]  ;;  %v1145_v11 = vld [vmem:[%s5024_s15 + $0xf0] sm:$0xff] }
 0x1c1   : > { %v1114_v29 = vmax.f32 %v1096_v25, 0.0  ;;  %v1091_v30 = vadd.f32 %v1090_v27, %v898_v63  ;;  %v2219_v63 = vld [vmem:[%s5017_s8 + $0x58] sm:$0xff] }
 0x1c2   : > { %2297 = vperm.xlu1 %3500, %v2219_v63   ;;  %2362 = vperm.xlu0 %3501, %v2232_v54   ;;  %v1099_v5 = vmax.f32 %v1021_v19, 0.0  ;;  %v2215_v25 = vld [vmem:[%s5017_s8 + $0x38] sm:$0xff]  ;;  %v1132_v63 = vld [vmem:[%s5024_s15 + $0x88] sm:$0xff]  ;;  %v4382_v19 = vpop.permute.xlu0 %1331 }
 0x1c3   : > { %v1113_v36 = vmax.f32 %v1091_v30, 0.0  ;;  %3231 = vmatprep.subr.mxu1 %v1114_v29  ;;  %v4222_v22 = vpop.permute.xlu1 %1256  ;;  %v1118_v27 = vld [vmem:[%s5024_s15 + $0x18] sm:$0xff] }
 0x1c4   : > { %3232 = vmatpush3.msra.mxu1 %v1114_v29  ;;  %v2214_v29 = vld [vmem:[%s5017_s8 + $0x30] sm:$0xff]  ;;  %v1146_v54 = vld [vmem:[%s5024_s15 + $0xf8] sm:$0xff] }
 0x1c5   : > { %3233 = vmatprep.subr.mxu1 %v1113_v36 }
 0x1c6   : > { %3234 = vmatpush3.msra.mxu1 %v1113_v36  ;;  %2292 = vperm.xlu1 %3500, %v2218_v10   ;;  %v2228_v36 = vld [vmem:[%s5017_s8 + $0xa0] sm:$0xff]  ;;  %v1137_v10 = vld [vmem:[%s5024_s15 + $0xb0] sm:$0xff] }
 0x1c7   : > { %3235 = vmatprep.subr.mxu1 %v1112_v38  ;;  %2357 = vperm.xlu0 %3501, %v2231_v9   ;;  %v4245_v30 = vpop.permute.xlu1 %1251 }
 0x1c8   : > { %3236 = vmatpush3.msra.mxu1 %v1112_v38  ;;  %v1122_v38 = vld [vmem:[%s5024_s15 + $0x38] sm:$0xff] }
 0x1c9   : > { %3237 = vmatprep.subr.mxu1 %v1111_v2 }
 0x1ca   : > { %3238 = vmatpush3.msra.mxu1 %v1111_v2  ;;  %2287 = vperm.xlu1 %3500, %v2217_v18   ;;  %v1125_v2 = vld [vmem:[%s5024_s15 + $0x50] sm:$0xff]  ;;  %v1144_v18 = vld [vmem:[%s5024_s15 + $0xe8] sm:$0xff] }
 0x1cb   : > { %3239 = vmatprep.subr.mxu1 %v1110_v3  ;;  %2352 = vperm.xlu0 %3501, %v2230_v26   ;;  %v4262_v37 = vpop.permute.xlu1 %1246 }
 0x1cc   : > { %3240 = vmatpush3.msra.mxu1 %v1110_v3  ;;  %v2226_v3 = vld [vmem:[%s5017_s8 + $0x90] sm:$0xff] }
 0x1cd   : > { %3241 = vmatprep.subr.mxu1 %v1109_v46 }
 0x1ce   : > { %3242 = vmatpush3.msra.mxu1 %v1109_v46  ;;  %2282 = vperm.xlu1 %3500, %v2216_v21   ;;  %v2225_v46 = vld [vmem:[%s5017_s8 + $0x88] sm:$0xff] }
 0x1cf   : > { %3243 = vmatprep.subr.mxu1 %v1108_v51  ;;  %2347 = vperm.xlu0 %3501, %v2229_v32   ;;  %v4285_v42 = vpop.permute.xlu1 %1241 }
 0x1d0   : > { %3244 = vmatpush3.msra.mxu1 %v1108_v51  ;;  %v1129_v51 = vld [vmem:[%s5024_s15 + $0x70] sm:$0xff] }
 0x1d1   : > { %3245 = vmatprep.subr.mxu1 %v1107_v60 }
 0x1d2   : > { %3246 = vmatpush3.msra.mxu1 %v1107_v60  ;;  %2277 = vperm.xlu1 %3500, %v2215_v25   ;;  %v2208_v60 = vld [vmem:[%s5017_s8] sm:$0xff] }
 0x1d3   : > { %3247 = vmatprep.subr.mxu1 %v1106_v62  ;;  %2342 = vperm.xlu0 %3501, %v2228_v36   ;;  %v4302_v47 = vpop.permute.xlu1 %1236 }
 0x1d4   : > { %3248 = vmatpush3.msra.mxu1 %v1106_v62  ;;  %v1601_v62 = vld [vmem:[%s5027_s18 + $0x8] sm:$0xff] }
 0x1d5   : > { %3249 = vmatprep.subr.mxu1 %v1105_v6 }
 0x1d6   : > { %3250 = vmatpush3.msra.mxu1 %v1105_v6  ;;  %2272 = vperm.xlu1 %3500, %v2214_v29  }
 0x1d7   : > { %3251 = vmatprep.subr.mxu1 %v1104_v8  ;;  %2337 = vperm.xlu0 %3501, %v2227_v40   ;;  %v4325_v61 = vpop.permute.xlu1 %1231 }
 0x1d8   : > { %3252 = vmatpush3.msra.mxu1 %v1104_v8  ;;  %v1136_v8 = vld [vmem:[%s5024_s15 + $0xa8] sm:$0xff] }
 0x1d9   : > { %3253 = vmatprep.subr.mxu1 %v1103_v14 }
 0x1da   : > { %3254 = vmatpush3.msra.mxu1 %v1103_v14  ;;  %2267 = vperm.xlu1 %3500, %v2213_v35   ;;  %v1140_v14 = vld [vmem:[%s5024_s15 + $0xc8] sm:$0xff] }
 0x1db   : > { %3255 = vmatprep.subr.mxu1 %v1102_v16  ;;  %2332 = vperm.xlu0 %3501, %v2226_v3   ;;  %v4341_v6 = vpop.permute.xlu1 %1226 }
 0x1dc   : > { %3256 = vmatpush3.msra.mxu1 %v1102_v16  ;;  %v1143_v16 = vld [vmem:[%s5024_s15 + $0xe0] sm:$0xff] }
 0x1dd   : > { %3257 = vmatprep.subr.mxu1 %v1101_v20 }
 0x1de   : > { %3258 = vmatpush3.msra.mxu1 %v1101_v20  ;;  %2262 = vperm.xlu1 %3500, %v2212_v39   ;;  %v4384_v20 = vpop.permute.xlu0 %1326 }
 0x1df   : > { %3259 = vmatprep.subr.mxu1 %v1100_v48  ;;  %2327 = vperm.xlu0 %3501, %v2225_v46   ;;  %v4391_v9 = vpop.permute.xlu1 %1221 }
 0x1e0   : > { %3260 = vmatpush3.msra.mxu1 %v1100_v48  ;;  %v1597_v48 = vld [vmem:[%s5026_s17 + $0x8] sm:$0xff] }
 0x1e1   : > { %3261 = vmatprep.subr.mxu1 %v1099_v5  ;;  %1676 = vmatprep.mubr.f32.mxu0 %v1597_v48 }
 0x1e2   : > { %3262 = vmatpush3.msra.mxu1 %v1099_v5  ;;  %2257 = vperm.xlu1 %3500, %v2211_v31   ;;  %v4389_v21 = vpop.permute.xlu0 %1321 }
 0x1e3   : > { %3264 = vmatmul.mubr.f32.vlgmr.msra.gmra.mxu1 %v1116_v50  ;;  %2322 = vperm.xlu0 %3501, %v2224_v55   ;;  %v4395_v50 = vpop.permute.xlu1 %1216 }
 0x1e4   : > { %3266 = vmatprep.mubr.f32.mxu1 %v1117_v23 }
 0x1e6   : > { %2252 = vperm.xlu1 %3500, %v2210_v45   ;;  %v4393_v5 = vpop.permute.xlu0 %1316 }
 0x1e7   : > { %3267 = vmatmul.mubr.f32.gmra.mxu1 %v1118_v27  ;;  %1609 = vperm.xlu0 %3501, %v1601_v62   ;;  %v4399_v25 = vpop.permute.xlu1 %1211 }
 0x1e8   : > { %3269 = vmatprep.mubr.f32.mxu1 %v1119_v28 }
 0x1ea   : > { %2247 = vperm.xlu1 %3500, %v2209_v53   ;;  %v4397_v23 = vpop.permute.xlu0 %1311 }
 0x1eb   : > { %3270 = vmatmul.mubr.f32.gmra.mxu1 %v1120_v33  ;;  %v4403_v27 = vpop.permute.xlu1 %1206 }
 0x1ec   : > { %3272 = vmatprep.mubr.f32.mxu1 %v1121_v34 }
 0x1ee   : > { %2242 = vperm.xlu1 %3500, %v2208_v60   ;;  %v4401_v26 = vpop.permute.xlu0 %1306 }
 0x1ef   : > { %3273 = vmatmul.mubr.f32.gmra.mxu1 %v1122_v38  ;;  %v4407_v29 = vpop.permute.xlu1 %1201 }
 0x1f0   : > { %3275 = vmatprep.mubr.f32.mxu1 %v1123_v24 }
 0x1f2   : > { %1604 = vperm.xlu1 %3500, %v1600_v0   ;;  %v4405_v28 = vpop.permute.xlu0 %1301 }
 0x1f3   : > { %3276 = vmatmul.mubr.f32.gmra.mxu1 %v1124_v41  ;;  %v4413_v34 = vpop.permute.xlu1 %1196 }
 0x1f4   : > { %3278 = vmatprep.mubr.f32.mxu1 %v1125_v2  ;;  %5051 = vst [vmem:[#allocation9_spill] sm:$0xff] %v4413_v34 }
 0x1f6   : > { %v4409_v32 = vpop.permute.xlu0 %1296 }
 0x1f7   : > { %3279 = vmatmul.mubr.f32.gmra.mxu1 %v1126_v43  ;;  %v4423_v39 = vpop.permute.xlu1 %1191 }
 0x1f8   : > { %3281 = vmatprep.mubr.f32.mxu1 %v1127_v44  ;;  %5055 = vst [vmem:[#allocation13_spill] sm:$0xff] %v4423_v39 }
 0x1fa   : > { %v4419_v38 = vpop.permute.xlu0 %1291 }
 0x1fb   : > { %3282 = vmatmul.mubr.f32.gmra.mxu1 %v1128_v49  ;;  %v4433_v3 = vpop.permute.xlu1 %1732 }
 0x1fc   : > { %3284 = vmatprep.mubr.f32.mxu1 %v1129_v51 }
 0x1fe   : > { %v4429_v2 = vpop.permute.xlu0 %1286 }
 0x1ff   : > { %3285 = vmatmul.mubr.f32.gmra.mxu1 %v1130_v57  ;;  %v4443_v49 = vpop.permute.xlu1 %1186 }
 0x200   : > { %3287 = vmatprep.mubr.f32.mxu1 %v1131_v59  ;;  %5056 = vst [vmem:[#allocation14_spill] sm:$0xff] %v4443_v49 }
 0x202   : > { %v4439_v45 = vpop.permute.xlu0 %1281 }
 0x203   : > { %3288 = vmatmul.mubr.f32.gmra.mxu1 %v1132_v63  ;;  %v4447_v59 = vpop.permute.xlu1 %1261 }
 0x204   : > { %3290 = vmatprep.mubr.f32.mxu1 %v1133_v4  ;;  %5057 = vst [vmem:[#allocation15_spill] sm:$0xff] %v4447_v59 }
 0x206   : > { %v4445_v55 = vpop.permute.xlu0 %1276 }
 0x207   : > { %3291 = vmatmul.mubr.f32.gmra.mxu1 %v1134_v7  ;;  %v4451_v0 = vpop.permute.xlu1 %1768 }
 0x208   : > { %3293 = vmatprep.mubr.f32.mxu1 %v1135_v56  ;;  %5059 = vst [vmem:[#allocation17_spill] sm:$0xff] %v4451_v0 }
 0x20a   : > { %v4449_v63 = vpop.permute.xlu0 %1271 }
 0x20b   : > { %3294 = vmatmul.mubr.f32.gmra.mxu1 %v1136_v8  ;;  %5058 = vst [vmem:[#allocation16_spill] sm:$0xff] %v4449_v63 }
 0x20c   : > { %3296 = vmatprep.mubr.f32.mxu1 %v1137_v10  ;;  %v4459_v10 = vpop.permute.xlu1 %1181 }
 0x20d   : > { %5063 = vst [vmem:[#allocation21_spill] sm:$0xff] %v4459_v10 }
 0x20e   : > { %v4457_v8 = vpop.permute.xlu0 %1266 }
 0x20f   : > { %3297 = vmatmul.mubr.f32.gmra.mxu1 %v1138_v12  ;;  %5062 = vst [vmem:[#allocation20_spill] sm:$0xff] %v4457_v8 }
 0x210   : > { %3299 = vmatprep.mubr.f32.mxu1 %v1139_v58 }
 0x213   : > { %3300 = vmatmul.mubr.f32.gmra.mxu1 %v1140_v14 }
 0x214   : > { %3302 = vmatprep.mubr.f32.mxu1 %v1141_v15  ;;  %v4467_v15 = vpop.permute.xlu0 %1727 }
 0x215   : > { %5065 = vst [vmem:[#allocation23_spill] sm:$0xff] %v4467_v15 }
 0x217   : > { %3303 = vmatmul.mubr.f32.gmra.mxu1 %v1142_v52  ;;  %v4469_v52 = vpop.permute.xlu1 %1764 }
 0x218   : > { %3305 = vmatprep.mubr.f32.mxu1 %v1143_v16  ;;  %5066 = vst [vmem:[#allocation24_spill] sm:$0xff] %v4469_v52 }
 0x21b   : > { %3306 = vmatmul.mubr.f32.gmra.mxu1 %v1144_v18  ;;  %v4477_v48 = vpop.permute.xlu1 %1717 }
 0x21c   : > { %3308 = vmatprep.mubr.f32.mxu1 %v1145_v11  ;;  %5068 = vst [vmem:[#allocation26_spill] sm:$0xff] %v4477_v48 }
 0x21f   : > { %3309 = vmatmul.mubr.f32.gmra.mxu1 %v1146_v54  ;;  %v4475_v54 = vpop.permute.xlu0 %1722 }
 0x220   : > { %5067 = vst [vmem:[#allocation25_spill] sm:$0xff] %v4475_v54 }
 0x223   : > { %v4479_v59 = vpop.permute.xlu0 %1836 }
 0x224   : > { %5069 = vst [vmem:[#allocation27_spill] sm:$0xff] %v4479_v59 }
 0x227   : > { %v4483_v52 = vpop.permute.xlu0 %1707 }
 0x228   : > { %5071 = vst [vmem:[#allocation29_spill] sm:$0xff] %v4483_v52 }
 0x2a3   : > { %v4411_v33 = vpop.f32.mrf.mxu1 }
 0x2a4   : > { %5050 = vst [vmem:[#allocation8_spill] sm:$0xff] %v4411_v33  ;;  %v4481_v33 = vpop.permute.xlu1 %1831 }
 0x2a5   : > { %v4415_v35 = vpop.f32.mrf.mxu1  ;;  %5070 = vst [vmem:[#allocation28_spill] sm:$0xff] %v4481_v33 }
 0x2a6   : > { %5052 = vst [vmem:[#allocation10_spill] sm:$0xff] %v4415_v35 }
 0x2a7   : > { %v4417_v36 = vpop.f32.mrf.mxu1 }
 0x2a8   : > { %5053 = vst [vmem:[#allocation11_spill] sm:$0xff] %v4417_v36  ;;  %v4485_v8 = vpop.permute.xlu1 %1712 }
 0x2a9   : > { %v4421_v24 = vpop.f32.mrf.mxu1  ;;  %5072 = vst [vmem:[#allocation30_spill] sm:$0xff] %v4485_v8  ;;  %v4494_v8 = vpop.permute.xlu0 %1702 }
 0x2aa   : > { %5054 = vst [vmem:[#allocation12_spill] sm:$0xff] %v4421_v24 }
 0x2ab   : > { %v4425_v40 = vpop.f32.mrf.mxu1 }
 0x2ad   : > { %v4427_v41 = vpop.f32.mrf.mxu1 }
 0x2af   : > { %v4431_v31 = vpop.f32.mrf.mxu1 }
 0x2b1   : > { %v4435_v43 = vpop.f32.mrf.mxu1 }
 0x2b3   : > { %v4437_v44 = vpop.f32.mrf.mxu1 }
 0x2b5   : > { %v4441_v46 = vpop.f32.mrf.mxu1 }
 0x2b7   : > { %v3280_v51 = vpop.f32.mrf.mxu1 }
 0x2b9   : > { %v1455_v53 = vpop.f32.mrf.mxu1 }
 0x2bb   : > { %v3283_v57 = vpop.f32.mrf.mxu1 }
 0x2bc   : > { %v1471_v63 = vadd.f32 %v3283_v57, %v4262_v37 }
 0x2bd   : > { %v1465_v60 = vpop.f32.mrf.mxu1 }
 0x2be   : > { %v1577_v37 = vmax.f32 %v1471_v63, 0.0 }
 0x2bf   : > { %v3286_v62 = vpop.f32.mrf.mxu1 }
 0x2c0   : > { %v1481_v0 = vadd.f32 %v3286_v62, %v4222_v22  ;;  %v4496_v22 = vpop.permute.xlu1 %1826 }
 0x2c1   : > { %v1475_v4 = vpop.f32.mrf.mxu1 }
 0x2c2   : > { %v1476_v48 = vadd.f32 %v1475_v4, %v4245_v30  ;;  %v1579_v36 = vmax.f32 %v1481_v0, 0.0 }
 0x2c3   : > { %v4453_v7 = vpop.f32.mrf.mxu1 }
 0x2c4   : > { %5060 = vst [vmem:[#allocation18_spill] sm:$0xff] %v4453_v7  ;;  %v1578_v30 = vmax.f32 %v1476_v48, 0.0 }
 0x2c5   : > { %v4455_v56 = vpop.f32.mrf.mxu1 }
 0x2c6   : > { %5061 = vst [vmem:[#allocation19_spill] sm:$0xff] %v4455_v56 }
 0x2c7   : > { %v4461_v12 = vpop.f32.mrf.mxu1 }
 0x2c9   : > { %v4463_v58 = vpop.f32.mrf.mxu1 }
 0x2ca   : > { %5064 = vst [vmem:[#allocation22_spill] sm:$0xff] %v4463_v58 }
 0x2cb   : > { %v4465_v14 = vpop.f32.mrf.mxu1 }
 0x2cd   : > { %v4471_v16 = vpop.f32.mrf.mxu1 }
 0x2cf   : > { %v3298_v18 = vpop.f32.mrf.mxu1 }
 0x2d1   : > { %v4473_v11 = vpop.f32.mrf.mxu1 }
 0x2d3   : > { %v3301_v35 = vpop.f32.mrf.mxu1 }
 0x2d5   : > { %v1525_v10 = vpop.f32.mrf.mxu1 }
 0x2d7   : > { %v3304_v56 = vpop.f32.mrf.mxu1 }
 0x2d9   : > { %v1535_v49 = vpop.f32.mrf.mxu1 }
 0x2db   : > { %v3307_v15 = vpop.f32.mrf.mxu1 }
 0x2dc   : > { %v1551_v58 = vadd.f32 %v3307_v15, %v4384_v20  ;;  %v1541_v20 = vadd.f32 %v3304_v56, %v4393_v5  ;;  %v4506_v5 = vpop.permute.xlu1 %1752  ;;  %v5073_v56 = vld [vmem:[#allocation9_spill] sm:$0xff]  ;;  %v5075_v15 = vld [vmem:[#allocation16_spill] sm:$0xff] }
 0x2dd   : > { %v1545_v7 = vpop.f32.mrf.mxu1 }
 0x2de   : > { %v1546_v52 = vadd.f32 %v1545_v7, %v4389_v21  ;;  %v1536_v21 = vadd.f32 %v1535_v49, %v4397_v23  ;;  %v1526_v23 = vadd.f32 %v1525_v10, %v4405_v28  ;;  %v1516_v28 = vadd.f32 %v4473_v11, %v4419_v38  ;;  %v5074_v10 = vld [vmem:[#allocation11_spill] sm:$0xff]  ;;  %v5078_v11 = vld [vmem:[#allocation12_spill] sm:$0xff] }
 0x2df   : > { %v3310_v24 = vpop.f32.mrf.mxu1  ;;  %v1506_v38 = vadd.f32 %v4471_v16, %v4439_v45  ;;  %v1742_v45 = vmul.f32 %v4433_v3, %v3938_v17  ;;  %v5080_v3 = vld [vmem:[#allocation20_spill] sm:$0xff] }
 0x2e0   : > { %v1561_v54 = vadd.f32 %v3310_v24, %v4333_v1  ;;  %v1466_v1 = vadd.f32 %v1465_v60, %v4285_v42  ;;  %v1593_v24 = vmax.f32 %v1551_v58, 0.0  ;;  %v1531_v42 = vadd.f32 %v3301_v35, %v4401_v26 }
 0x2e1   : > { %v1555_v39 = vpop.f32.mrf.mxu1  ;;  %v1590_v49 = vmax.f32 %v1536_v21, 0.0  ;;  %v1521_v26 = vadd.f32 %v3298_v18, %v4409_v32  ;;  %v1588_v60 = vmax.f32 %v1526_v23, 0.0  ;;  %v1511_v32 = vadd.f32 %v4465_v14, %v4429_v2  ;;  %v5086_v23 = vld [vmem:[#allocation24_spill] sm:$0xff] }
 0x2e2   : > { %v1556_v59 = vadd.f32 %v1555_v39, %v4382_v19  ;;  %v1595_v33 = vmax.f32 %v1561_v54, 0.0  ;;  %v1461_v19 = vadd.f32 %v3280_v51, %v4302_v47  ;;  %v1592_v39 = vmax.f32 %v1546_v52, 0.0  ;;  %v5076_v52 = vld [vmem:[#allocation22_spill] sm:$0xff] }
 0x2e3   : > { %v1576_v57 = vmax.f32 %v1466_v1, 0.0  ;;  %v1451_v47 = vadd.f32 %v4437_v44, %v4341_v6  ;;  %v1589_v35 = vmax.f32 %v1531_v42, 0.0  ;;  %v1441_v6 = vadd.f32 %v4431_v31, %v4395_v50  ;;  %v5081_v1 = vld [vmem:[#allocation18_spill] sm:$0xff] }
 0x2e4   : > { %v1594_v34 = vmax.f32 %v1556_v59, 0.0  ;;  %3040 = vmatprep.subr.mxu0 %v1595_v33  ;;  %v1456_v33 = vadd.f32 %v1455_v53, %v4325_v61  ;;  %v1591_v59 = vmax.f32 %v1541_v20, 0.0  ;;  %v1446_v61 = vadd.f32 %v4441_v46, %v4391_v9  ;;  %v4514_v53 = vpop.permute.xlu1 %1821 }
 0x2e5   : > { %3041 = vmatpush3.msra.mxu0 %v1579_v36  ;;  %v4504_v36 = vpop.permute.xlu0 %1816  ;;  %v1573_v44 = vmax.f32 %v1451_v47, 0.0  ;;  %v1436_v9 = vadd.f32 %v4435_v43, %v4399_v25  ;;  %v1587_v63 = vmax.f32 %v1521_v26, 0.0  ;;  %v1431_v50 = vadd.f32 %v4425_v40, %v4403_v27  ;;  %v5085_v47 = vld [vmem:[#allocation23_spill] sm:$0xff] }
 0x2e6   : > { %3042 = vmatprep.subr.mxu0 %v1594_v34  ;;  %v1575_v34 = vmax.f32 %v1461_v19, 0.0  ;;  %v1574_v51 = vmax.f32 %v1456_v33, 0.0  ;;  %v1572_v46 = vmax.f32 %v1446_v61, 0.0  ;;  %v1571_v31 = vmax.f32 %v1441_v6, 0.0  ;;  %v5083_v33 = vld [vmem:[#allocation14_spill] sm:$0xff]  ;;  %v5087_v61 = vld [vmem:[#allocation15_spill] sm:$0xff] }
 0x2e7   : > { %3043 = vmatpush3.msra.mxu0 %v1578_v30  ;;  %v1586_v4 = vmax.f32 %v1516_v28, 0.0  ;;  %v1426_v2 = vadd.f32 %v4427_v41, %v4407_v29  ;;  %v1570_v7 = vmax.f32 %v1436_v9, 0.0  ;;  %v1501_v27 = vadd.f32 %v4461_v12, %v4445_v55  ;;  %v5077_v41 = vld [vmem:[#allocation13_spill] sm:$0xff] }
 0x2e8   : > { %3044 = vmatprep.subr.mxu0 %v1593_v24  ;;  %v4529_v43 = vpop.permute.xlu1 %1748  ;;  %v1585_v40 = vmax.f32 %v1511_v32, 0.0  ;;  %v1421_v58 = vadd.f32 %v5074_v10, %v5073_v56  ;;  %v1569_v14 = vmax.f32 %v1431_v50, 0.0  ;;  %v1496_v16 = vadd.f32 %v5076_v52, %v5075_v15  ;;  %v5079_v12 = vld [vmem:[#allocation17_spill] sm:$0xff]  ;;  %v5082_v24 = vld [vmem:[#allocation26_spill] sm:$0xff]  ;;  %v1596_v10 = vld [vmem:[%s5026_s17] sm:$0xff] }
 0x2e9   : > { %3045 = vmatpush3.msra.mxu0 %v1577_v37  ;;  %v1773_v62 = vpop.permute.xlu0 %1772  ;;  %v1584_v18 = vmax.f32 %v1506_v38, 0.0  ;;  %v1416_v54 = vadd.f32 %v5078_v11, %v5077_v41  ;;  %v1568_v55 = vmax.f32 %v1426_v2, 0.0  ;;  %v1781_v48 = vmul.f32 %v5079_v12, %v3929_v13  ;;  %v5089_v6 = vld [vmem:[#allocation25_spill] sm:$0xff]  ;;  %v5093_v50 = vld [vmem:[#allocation30_spill] sm:$0xff]  ;;  %v5094_v2 = vld [vmem:[#allocation28_spill] sm:$0xff] }
 0x2ea   : > { %3046 = vmatprep.subr.mxu0 %v1592_v39  ;;  %v1782_v0 = vmul.f32 %v1773_v62, %v3929_v13  ;;  %v1491_v30 = vadd.f32 %v5081_v1, %v5080_v3  ;;  %v1583_v20 = vmax.f32 %v1501_v27, 0.0  ;;  %v1739_v19 = vmul.f32 %v5082_v24, %v3938_v17  ;;  %v5090_v28 = vld [vmem:[#allocation21_spill] sm:$0xff] }
 0x2eb   : > { %3047 = vmatpush3.msra.mxu0 %v1576_v57  ;;  %v5084_v57 = vld [vmem:[#allocation8_spill] sm:$0xff]  ;;  %v1566_v9 = vmax.f32 %v1416_v54, 0.0  ;;  %v1777_v15 = vmul.f32 %v4506_v5, %v3929_v13  ;;  %v1598_v12 = vld [vmem:[%s5026_s17 + $0x10] sm:$0xff] }
 0x2ec   : > { %3048 = vmatprep.subr.mxu0 %v1591_v59  ;;  %v1790_v29 = vadd.f32 %v1782_v0, %v1742_v45  ;;  %v1698_v39 = vpop.permute.xlu1 %1697  ;;  %v1411_v42 = vadd.f32 %v5084_v57, %v5083_v33  ;;  %v1567_v59 = vmax.f32 %v1421_v58, 0.0  ;;  %v1856_v57 = vld [vmem:[%s5014_s5 + $0x8] sm:$0xff] }
 0x2ed   : > { %3049 = vmatpush3.msra.mxu0 %v1575_v34  ;;  %v1761_v25 = vpop.permute.xlu0 %1760  ;;  %v1741_v34 = vmul.f32 %v5085_v47, %v3938_v17  ;;  %v1859_v47 = vld [vmem:[%s5014_s5 + $0x20] sm:$0xff] }
 0x2ee   : > { %3050 = vmatprep.subr.mxu0 %v1590_v49  ;;  %v1779_v37 = vmul.f32 %v1761_v25, %v3929_v13  ;;  %v1780_v49 = vmul.f32 %v5086_v23, %v3929_v13  ;;  %v1565_v25 = vmax.f32 %v1411_v42, 0.0  ;;  %v1857_v42 = vld [vmem:[%s5014_s5 + $0x10] sm:$0xff] }
 0x2ef   : > { %3051 = vmatpush3.msra.mxu0 %v1574_v51  ;;  %v5088_v51 = vld [vmem:[#allocation19_spill] sm:$0xff]  ;;  %v1861_v23 = vld [vmem:[%s5014_s5 + $0x30] sm:$0xff] }
 0x2f0   : > { %3052 = vmatprep.subr.mxu0 %v1589_v35  ;;  %v1486_v26 = vadd.f32 %v5088_v51, %v5087_v61  ;;  %v1582_v35 = vmax.f32 %v1496_v16, 0.0  ;;  %v1787_v0 = vadd.f32 %v1779_v37, %v1739_v19  ;;  %v1812_v45 = vpop.permute.xlu1 %1811  ;;  %v1599_v16 = vld [vmem:[%s5026_s17 + $0x18] sm:$0xff]  ;;  %v1863_v61 = vld [vmem:[%s5014_s5 + $0x40] sm:$0xff]  ;;  %v1864_v51 = vld [vmem:[%s5014_s5 + $0x48] sm:$0xff] }
 0x2f1   : > { %3053 = vmatpush3.msra.mxu0 %v1573_v44  ;;  %v1757_v21 = vpop.permute.xlu0 %1756  ;;  %v1740_v44 = vmul.f32 %v5089_v6, %v3938_v17  ;;  %v1867_v6 = vld [vmem:[%s5014_s5 + $0x60] sm:$0xff] }
 0x2f2   : > { %3054 = vmatprep.subr.mxu0 %v1588_v60  ;;  %v5091_v60 = vld [vmem:[#allocation10_spill] sm:$0xff]  ;;  %v1778_v38 = vmul.f32 %v1757_v21, %v3929_v13  ;;  %v1843_v41 = vadd.f32 %v4514_v53, %v1787_v0  ;;  %v1736_v53 = vmul.f32 %v4494_v8, %v3938_v17 }
 0x2f3   : > { %3055 = vmatpush3.msra.mxu0 %v1572_v46  ;;  %v1406_v62 = vadd.f32 %v5091_v60, %v5090_v28  ;;  %v5092_v46 = vld [vmem:[#allocation27_spill] sm:$0xff]  ;;  %v1788_v27 = vadd.f32 %v1780_v49, %v1740_v44  ;;  %v1862_v49 = vld [vmem:[%s5014_s5 + $0x38] sm:$0xff]  ;;  %v1868_v44 = vld [vmem:[%s5014_s5 + $0x68] sm:$0xff] }
 0x2f4   : > { %3056 = vmatprep.subr.mxu0 %v1587_v63  ;;  %v1846_v32 = vadd.f32 %v5092_v46, %v1790_v29  ;;  %v1789_v63 = vadd.f32 %v1781_v48, %v1741_v34  ;;  %v1807_v1 = vpop.permute.xlu1 %1806  ;;  %v1860_v34 = vld [vmem:[%s5014_s5 + $0x28] sm:$0xff]  ;;  %v1869_v28 = vld [vmem:[%s5014_s5 + $0x70] sm:$0xff]  ;;  %v1870_v60 = vld [vmem:[%s5014_s5 + $0x78] sm:$0xff] }
 0x2f5   : > { %3057 = vmatpush3.msra.mxu0 %v1571_v31  ;;  %v1738_v31 = vmul.f32 %v5093_v50, %v3938_v17  ;;  %v1564_v56 = vmax.f32 %v1406_v62, 0.0  ;;  %v1745_v11 = vpop.permute.xlu0 %1744 }
 0x2f6   : > { %3058 = vmatprep.subr.mxu0 %v1586_v4  ;;  %v1581_v4 = vmax.f32 %v1491_v30, 0.0  ;;  %v1854_v52 = vmax.f32 %v1846_v32, 0.0  ;;  %v1775_v5 = vmul.f32 %v1745_v11, %v3929_v13  ;;  %v1851_v30 = vmax.f32 %v1843_v41, 0.0 }
 0x2f7   : > { %3059 = vmatpush3.msra.mxu0 %v1570_v7  ;;  %v1845_v7 = vadd.f32 %v5094_v2, %v1789_v63  ;;  %v1786_v58 = vadd.f32 %v1778_v38, %v1738_v31 }
 0x2f8   : > { %3060 = vmatprep.subr.mxu0 %v1585_v40  ;;  %v1580_v40 = vmax.f32 %v1486_v26, 0.0  ;;  %v1865_v26 = vld [vmem:[%s5014_s5 + $0x50] sm:$0xff]  ;;  %v4653_v62 = vpop.permute.xlu1 %1964 }
 0x2f9   : > { %3061 = vmatpush3.msra.mxu0 %v1569_v14  ;;  %v1844_v14 = vadd.f32 %v4496_v22, %v1788_v27  ;;  %v1853_v54 = vmax.f32 %v1845_v7, 0.0  ;;  %v1776_v22 = vmul.f32 %v4529_v43, %v3929_v13  ;;  %v1842_v43 = vadd.f32 %v4504_v36, %v1786_v58  ;;  %v1855_v13 = vld [vmem:[%s5014_s5] sm:$0xff]  ;;  %v1802_v37 = vpop.permute.xlu0 %1801 }
 0x2fa   : > { %3062 = vmatprep.subr.mxu0 %v1584_v18  ;;  %v5095_v18 = vld [vmem:[#allocation29_spill] sm:$0xff] }
 0x2fb   : > { %3063 = vmatpush3.msra.mxu0 %v1568_v55  ;;  %v1737_v29 = vmul.f32 %v5095_v18, %v3938_v17  ;;  %v1735_v55 = vmul.f32 %v1698_v39, %v3938_v17  ;;  %v1852_v48 = vmax.f32 %v1844_v14, 0.0  ;;  %v1784_v24 = vadd.f32 %v1776_v22, %v1736_v53 }
 0x2fc   : > { %3064 = vmatprep.subr.mxu0 %v1583_v20  ;;  %v1850_v8 = vmax.f32 %v1842_v43, 0.0 }
 0x2fd   : > { %3065 = vmatpush3.msra.mxu0 %v1567_v59  ;;  %v1785_v3 = vadd.f32 %v1777_v15, %v1737_v29  ;;  %v1783_v19 = vadd.f32 %v1775_v5, %v1735_v55  ;;  %v1840_v17 = vadd.f32 %v1807_v1, %v1784_v24  ;;  %v1858_v59 = vld [vmem:[%s5014_s5 + $0x18] sm:$0xff]  ;;  %v4659_v32 = vpop.permute.xlu0 %1954 }
 0x2fe   : > { %3066 = vmatprep.subr.mxu0 %v1582_v35  ;;  %v1866_v35 = vld [vmem:[%s5014_s5 + $0x58] sm:$0xff] }
 0x2ff   : > { %3067 = vmatpush3.msra.mxu0 %v1566_v9  ;;  %v1841_v20 = vadd.f32 %v1812_v45, %v1785_v3  ;;  %v1839_v21 = vadd.f32 %v1802_v37, %v1783_v19  ;;  %v1848_v39 = vmax.f32 %v1840_v17, 0.0  ;;  %v4655_v9 = vpop.permute.xlu1 %1959 }
 0x300   : > { %3068 = vmatprep.subr.mxu0 %v1581_v4 }
 0x301   : > { %3069 = vmatpush3.msra.mxu0 %v1565_v25  ;;  %v1849_v36 = vmax.f32 %v1841_v20, 0.0  ;;  %v1847_v33 = vmax.f32 %v1839_v21, 0.0  ;;  %v4663_v50 = vpop.permute.xlu0 %1944 }
 0x302   : > { %3070 = vmatprep.subr.mxu0 %v1580_v40 }
 0x303   : > { %3071 = vmatpush3.msra.mxu0 %v1564_v56  ;;  %v4657_v46 = vpop.permute.xlu1 %1949 }
 0x304   : > { %1677 = vmatmul.mubr.f32.vlgmr.msra.gmra.mxu0 %v1596_v10  ;;  %3311 = vmatprep.subr.mxu0 %v1854_v52 }
 0x305   : > { %3312 = vmatpush3.msra.mxu0 %v1854_v52  ;;  %1681 = vmatprep.mubr.f32.mxu0 %v1599_v16  ;;  %v4667_v38 = vpop.permute.xlu0 %1934 }
 0x306   : > { %3313 = vmatprep.subr.mxu0 %v1853_v54 }
 0x307   : > { %3314 = vmatpush3.msra.mxu0 %v1853_v54  ;;  %v4661_v63 = vpop.permute.xlu1 %1939 }
 0x308   : > { %1682 = vmatmul.mubr.f32.gmra.mxu0 %v1598_v12  ;;  %3315 = vmatprep.subr.mxu0 %v1852_v48  ;;  %v2176_v12 = vld [vmem:[%s5016_s7] sm:$0xff] }
 0x309   : > { %3316 = vmatpush3.msra.mxu0 %v1852_v48  ;;  %3327 = vmatprep.mubr.msk.f32.mxu0 %vm905_vm0, %v1855_v13  ;;  %v4671_v0 = vpop.permute.xlu0 %1924 }
 0x30a   : > { %3317 = vmatprep.subr.mxu0 %v1851_v30 }
 0x30b   : > { %3318 = vmatpush3.msra.mxu0 %v1851_v30  ;;  %v4665_v31 = vpop.permute.xlu1 %1929 }
 0x30c   : > { %3319 = vmatprep.subr.mxu0 %v1850_v8 }
 0x30d   : > { %3320 = vmatpush3.msra.mxu0 %v1850_v8  ;;  %v4675_v2 = vpop.permute.xlu0 %1914 }
 0x30e   : > { %3321 = vmatprep.subr.mxu0 %v1849_v36 }
 0x30f   : > { %3322 = vmatpush3.msra.mxu0 %v1849_v36  ;;  %v4669_v4 = vpop.permute.xlu1 %1919 }
 0x310   : > { %3323 = vmatprep.subr.mxu0 %v1848_v39 }
 0x311   : > { %3324 = vmatpush3.msra.mxu0 %v1848_v39  ;;  %v4679_v27 = vpop.permute.xlu0 %1904  ;;  %v616_v39 = vld [vmem:[%s614_s22] sm:$0xf]  ;;  %s5117_s22 = sld [smem:[#allocation33_spill]] }
 0x312   : > { %3325 = vmatprep.subr.mxu0 %v1847_v33 }
 0x313   : > { %3326 = vmatpush3.msra.mxu0 %v1847_v33  ;;  %v4673_v25 = vpop.permute.xlu1 %1909 }
 0x314   : > { %3328 = vmatmul.mubr.msk.f32.vlgmr.msra.gmra.mxu0 %vm905_vm0, %v1856_v57 }
 0x315   : > { %3330 = vmatprep.mubr.msk.f32.mxu0 %vm905_vm0, %v1857_v42  ;;  %v4683_v45 = vpop.permute.xlu0 %1894  ;;  %v2749_v42 = vrot.slane %v616_v39, 4 }
 0x317   : > { %v4677_v7 = vpop.permute.xlu1 %1899 }
 0x318   : > { %3331 = vmatmul.mubr.msk.f32.gmra.mxu0 %vm905_vm0, %v1858_v59 }
 0x319   : > { %3333 = vmatprep.mubr.msk.f32.mxu0 %vm905_vm0, %v1859_v47  ;;  %v4687_v10 = vpop.permute.xlu0 %2397 }
 0x31b   : > { %v4681_v40 = vpop.permute.xlu1 %1889 }
 0x31c   : > { %3334 = vmatmul.mubr.msk.f32.gmra.mxu0 %vm905_vm0, %v1860_v34 }
 0x31d   : > { %3336 = vmatprep.mubr.msk.f32.mxu0 %vm905_vm0, %v1861_v23  ;;  %v4691_v14 = vpop.permute.xlu0 %2392 }
 0x31f   : > { %v4685_v56 = vpop.permute.xlu1 %2317 }
 0x320   : > { %3337 = vmatmul.mubr.msk.f32.gmra.mxu0 %vm905_vm0, %v1862_v49 }
 0x321   : > { %3339 = vmatprep.mubr.msk.f32.mxu0 %vm905_vm0, %v1863_v61  ;;  %v4695_v52 = vpop.permute.xlu0 %2387  ;;  %v2752_v61 = vsel %vm2751_vm1, %v616_v39, %v2749_v42 }
 0x323   : > { %v4689_v58 = vpop.permute.xlu1 %2312 }
 0x324   : > { %3340 = vmatmul.mubr.msk.f32.gmra.mxu0 %vm905_vm0, %v1864_v51 }
 0x325   : > { %3342 = vmatprep.mubr.msk.f32.mxu0 %vm905_vm0, %v1865_v26  ;;  %v4699_v18 = vpop.permute.xlu0 %2382 }
 0x327   : > { %v4693_v15 = vpop.permute.xlu1 %2307 }
 0x328   : > { %3343 = vmatmul.mubr.msk.f32.gmra.mxu0 %vm905_vm0, %v1866_v35 }
 0x329   : > { %3345 = vmatprep.mubr.msk.f32.mxu0 %vm905_vm0, %v1867_v6  ;;  %v4703_v41 = vpop.permute.xlu0 %2377 }
 0x32b   : > { %v4697_v16 = vpop.permute.xlu1 %2302 }
 0x32c   : > { %3346 = vmatmul.mubr.msk.f32.gmra.mxu0 %vm905_vm0, %v1868_v44 }
 0x32d   : > { %3348 = vmatprep.mubr.msk.f32.mxu0 %vm905_vm0, %v1869_v28  ;;  %v4707_v54 = vpop.permute.xlu0 %2372 }
 0x32f   : > { %v4701_v29 = vpop.permute.xlu1 %2297 }
 0x330   : > { %3349 = vmatmul.mubr.msk.f32.gmra.mxu0 %vm905_vm0, %v1870_v60 }
 0x331   : > { %v4711_v55 = vpop.permute.xlu0 %2367  ;;  %3383 = vmatprep.mubr.f32.mxu0 %v2176_v12 }
 0x333   : > { %v4705_v11 = vpop.permute.xlu1 %2292 }
 0x335   : > { %v4718_v53 = vpop.permute.xlu0 %2362 }
 0x337   : > { %v4709_v22 = vpop.permute.xlu1 %2287 }
 0x339   : > { %v4722_v3 = vpop.permute.xlu0 %2357 }
 0x33b   : > { %v4713_v5 = vpop.permute.xlu1 %2282 }
 0x33d   : > { %v4726_v13 = vpop.permute.xlu0 %2352 }
 0x33f   : > { %v4720_v48 = vpop.permute.xlu1 %2277 }
 0x341   : > { %v4730_v30 = vpop.permute.xlu0 %2347 }
 0x343   : > { %v4724_v43 = vpop.permute.xlu1 %2272 }
 0x345   : > { %v4734_v24 = vpop.permute.xlu0 %2342 }
 0x346   : > { %5097 = vst [vmem:[#allocation11_spill] sm:$0xff] %v4734_v24 }
 0x347   : > { %v4728_v1 = vpop.permute.xlu1 %2267 }
 0x349   : > { %v4738_v17 = vpop.permute.xlu0 %2337 }
 0x34a   : > { %5099 = vst [vmem:[#allocation22_spill] sm:$0xff] %v4738_v17 }
 0x34b   : > { %v4732_v20 = vpop.permute.xlu1 %2262 }
 0x34c   : > { %5096 = vst [vmem:[#allocation9_spill] sm:$0xff] %v4732_v20 }
 0x34d   : > { %v4742_v37 = vpop.permute.xlu0 %2332 }
 0x34e   : > { %5101 = vst [vmem:[#allocation12_spill] sm:$0xff] %v4742_v37 }
 0x34f   : > { %v4736_v19 = vpop.permute.xlu1 %2257 }
 0x350   : > { %5098 = vst [vmem:[#allocation16_spill] sm:$0xff] %v4736_v19 }
 0x351   : > { %v4750_v21 = vpop.permute.xlu0 %2327 }
 0x352   : > { %5104 = vst [vmem:[#allocation20_spill] sm:$0xff] %v4750_v21 }
 0x353   : > { %v4740_v8 = vpop.permute.xlu1 %2252 }
 0x354   : > { %5100 = vst [vmem:[#allocation13_spill] sm:$0xff] %v4740_v8 }
 0x355   : > { %v4754_v59 = vpop.permute.xlu0 %2322 }
 0x356   : > { %5106 = vst [vmem:[#allocation26_spill] sm:$0xff] %v4754_v59 }
 0x357   : > { %v4745_v36 = vpop.permute.xlu1 %2247 }
 0x358   : > { %5102 = vst [vmem:[#allocation17_spill] sm:$0xff] %v4745_v36 }
 0x359   : > { %v1610_v44 = vpop.permute.xlu0 %1609 }
 0x35b   : > { %v4752_v33 = vpop.permute.xlu1 %2242 }
 0x35c   : > { %5105 = vst [vmem:[#allocation18_spill] sm:$0xff] %v4752_v33 }
 0x35f   : > { %v1605_v23 = vpop.permute.xlu1 %1604 }
 0x3c4   : > { %v3072_v57 = vpop.f32.mrf.mxu0 }
 0x3c6   : > { %v3073_v47 = vpop.f32.mrf.mxu0 }
 0x3c7   : > { %v3074_v34 = vadd.f32 %v3073_v47, %v3072_v57  ;;  %v2661_v57 = vld [vmem:[%s5019_s10] sm:$0xff] }
 0x3c8   : > { %v3075_v49 = vpop.f32.mrf.mxu0 }
 0x3c9   : > { %v1679_v51 = vadd.f32 %v3074_v34, %v1605_v23 }
 0x3ca   : > { %v3076_v26 = vpop.f32.mrf.mxu0 }
 0x3cb   : > { %v3077_v35 = vadd.f32 %v3076_v26, %v3075_v49  ;;  %v2753_v6 = vmul.f32 %v2752_v61, %v1679_v51  ;;  %v2662_v49 = vld [vmem:[%s5019_s10 + $0x8] sm:$0xff] }
 0x3cd   : > { %v1684_v28 = vadd.f32 %v3077_v35, %v1610_v44  ;;  %2755 = vadd.xlane.f32.xlu1 %v2753_v6 }
 0x3cf   : > { %v2754_v60 = vmul.f32 %v2752_v61, %v1684_v28 }
 0x3d1   : > { %2757 = vadd.xlane.f32.xlu0 %v2754_v60 }
 0x3d4   : > { %v4756_v12 = vpop.f32.mrf.mxu0 }
 0x3d6   : > { %v4758_v33 = vpop.f32.mrf.mxu0 }
 0x3d8   : > { %v3332_v36 = vpop.f32.mrf.mxu0 }
 0x3da   : > { %v2091_v59 = vpop.f32.mrf.mxu0 }
 0x3dc   : > { %v3335_v39 = vpop.f32.mrf.mxu0 }
 0x3de   : > { %v2101_v42 = vpop.f32.mrf.mxu0  ;;  %2665 = vperm.xlu1 %3500, %v2661_v57  }
 0x3e0   : > { %v3338_v47 = vpop.f32.mrf.mxu0 }
 0x3e2   : > { %v2111_v34 = vpop.f32.mrf.mxu0 }
 0x3e4   : > { %v3341_v23 = vpop.f32.mrf.mxu0 }
 0x3e6   : > { %v2121_v61 = vpop.f32.mrf.mxu0 }
 0x3e7   : > { %2670 = vperm.xlu0 %3501, %v2662_v49  }
 0x3e8   : > { %v3344_v51 = vpop.f32.mrf.mxu0 }
 0x3e9   : > { %v2137_v49 = vadd.f32 %v3344_v51, %v4663_v50  ;;  %v2117_v50 = vadd.f32 %v3338_v47, %v4671_v0  ;;  %v2097_v0 = vadd.f32 %v3332_v36, %v4679_v27  ;;  %v2184_v47 = vld [vmem:[%s5016_s7 + $0x40] sm:$0xff] }
 0x3ea   : > { %v2131_v26 = vpop.f32.mrf.mxu0  ;;  %v2188_v51 = vld [vmem:[%s5016_s7 + $0x60] sm:$0xff] }
 0x3eb   : > { %v2132_v20 = vadd.f32 %v2131_v26, %v4661_v63  ;;  %v2112_v63 = vadd.f32 %v2111_v34, %v4669_v4  ;;  %v2092_v4 = vadd.f32 %v2091_v59, %v4677_v7  ;;  %v2177_v7 = vld [vmem:[%s5016_s7 + $0x8] sm:$0xff] }
 0x3ec   : > { %v3347_v35 = vpop.f32.mrf.mxu0  ;;  %v2181_v59 = vld [vmem:[%s5016_s7 + $0x28] sm:$0xff] }
 0x3ed   : > { %v2147_v21 = vadd.f32 %v3347_v35, %v4659_v32  ;;  %v2171_v32 = vmax.f32 %v2137_v49, 0.0  ;;  %v2185_v34 = vld [vmem:[%s5016_s7 + $0x48] sm:$0xff]  ;;  %v2190_v35 = vld [vmem:[%s5016_s7 + $0x70] sm:$0xff]  ;;  %v2196_v49 = vld [vmem:[%s5016_s7 + $0xa0] sm:$0xff] }
 0x3ee   : > { %v2141_v6 = vpop.f32.mrf.mxu0  ;;  %v2189_v26 = vld [vmem:[%s5016_s7 + $0x68] sm:$0xff] }
 0x3ef   : > { %v2142_v37 = vadd.f32 %v2141_v6, %v4657_v46  ;;  %v2173_v17 = vmax.f32 %v2147_v21, 0.0  ;;  %v2170_v46 = vmax.f32 %v2132_v20, 0.0  ;;  %v2166_v20 = vmax.f32 %v2112_v63, 0.0  ;;  %v2191_v6 = vld [vmem:[%s5016_s7 + $0x78] sm:$0xff] }
 0x3f0   : > { %v3350_v44 = vpop.f32.mrf.mxu0  ;;  %v2163_v21 = vmax.f32 %v2097_v0, 0.0  ;;  %v2203_v63 = vld [vmem:[%s5016_s7 + $0xd8] sm:$0xff] }
 0x3f1   : > { %v2157_v28 = vadd.f32 %v3350_v44, %v4653_v62  ;;  %v2172_v24 = vmax.f32 %v2142_v37, 0.0  ;;  %v2127_v62 = vadd.f32 %v3341_v23, %v4667_v38  ;;  %v2107_v38 = vadd.f32 %v3335_v39, %v4675_v2  ;;  %v2186_v23 = vld [vmem:[%s5016_s7 + $0x50] sm:$0xff]  ;;  %v2192_v44 = vld [vmem:[%s5016_s7 + $0x80] sm:$0xff] }
 0x3f2   : > { %v2151_v60 = vpop.f32.mrf.mxu0  ;;  %v2087_v2 = vadd.f32 %v4756_v12, %v4683_v45  ;;  %v2162_v39 = vmax.f32 %v2092_v4, 0.0  ;;  %v2178_v45 = vld [vmem:[%s5016_s7 + $0x10] sm:$0xff] }
 0x3f3   : > { %v2175_v57 = vmax.f32 %v2157_v28, 0.0  ;;  %v2152_v8 = vadd.f32 %v2151_v60, %v4655_v9  ;;  %v2122_v9 = vadd.f32 %v2121_v61, %v4665_v31  ;;  %v2102_v31 = vadd.f32 %v2101_v42, %v4673_v25  ;;  %v2182_v12 = vld [vmem:[%s5016_s7 + $0x30] sm:$0xff]  ;;  %v2183_v42 = vld [vmem:[%s5016_s7 + $0x38] sm:$0xff]  ;;  %v2193_v28 = vld [vmem:[%s5016_s7 + $0x88] sm:$0xff] }
 0x3f4   : > { %v2082_v25 = vadd.f32 %v4758_v33, %v4681_v40  ;;  %v2161_v27 = vmax.f32 %v2087_v2, 0.0  ;;  %v2179_v40 = vld [vmem:[%s5016_s7 + $0x18] sm:$0xff]  ;;  %v2180_v33 = vld [vmem:[%s5016_s7 + $0x20] sm:$0xff]  ;;  %v2194_v60 = vld [vmem:[%s5016_s7 + $0x90] sm:$0xff] }
 0x3f5   : > { %v2174_v19 = vmax.f32 %v2152_v8, 0.0  ;;  %3351 = vmatprep.subr.mxu0 %v2175_v57  ;;  %v2169_v8 = vmax.f32 %v2127_v62, 0.0  ;;  %v2164_v37 = vmax.f32 %v2102_v31, 0.0  ;;  %v2187_v61 = vld [vmem:[%s5016_s7 + $0x58] sm:$0xff]  ;;  %v2197_v62 = vld [vmem:[%s5016_s7 + $0xa8] sm:$0xff] }
 0x3f6   : > { %3352 = vmatpush3.msra.mxu0 %v2175_v57  ;;  %v2160_v36 = vmax.f32 %v2082_v25, 0.0  ;;  %v2195_v57 = vld [vmem:[%s5016_s7 + $0x98] sm:$0xff] }
 0x3f7   : > { %3353 = vmatprep.subr.mxu0 %v2174_v19  ;;  %v2207_v31 = vld [vmem:[%s5016_s7 + $0xf8] sm:$0xff] }
 0x3f8   : > { %3354 = vmatpush3.msra.mxu0 %v2174_v19  ;;  %v2168_v19 = vmax.f32 %v2122_v9, 0.0  ;;  %v2199_v9 = vld [vmem:[%s5016_s7 + $0xb8] sm:$0xff] }
 0x3f9   : > { %3355 = vmatprep.subr.mxu0 %v2173_v17 }
 0x3fa   : > { %3356 = vmatpush3.msra.mxu0 %v2173_v17  ;;  %v2167_v17 = vmax.f32 %v2117_v50, 0.0  ;;  %v2201_v50 = vld [vmem:[%s5016_s7 + $0xc8] sm:$0xff] }
 0x3fb   : > { %3357 = vmatprep.subr.mxu0 %v2172_v24 }
 0x3fc   : > { %3358 = vmatpush3.msra.mxu0 %v2172_v24  ;;  %v2165_v24 = vmax.f32 %v2107_v38, 0.0  ;;  %v2205_v38 = vld [vmem:[%s5016_s7 + $0xe8] sm:$0xff] }
 0x3fd   : > { %3359 = vmatprep.subr.mxu0 %v2171_v32 }
 0x3fe   : > { %3360 = vmatpush3.msra.mxu0 %v2171_v32  ;;  %v2198_v32 = vld [vmem:[%s5016_s7 + $0xb0] sm:$0xff] }
 0x3ff   : > { %3361 = vmatprep.subr.mxu0 %v2170_v46 }
 0x400   : > { %3362 = vmatpush3.msra.mxu0 %v2170_v46  ;;  %v2200_v46 = vld [vmem:[%s5016_s7 + $0xc0] sm:$0xff] }
 0x401   : > { %3363 = vmatprep.subr.mxu0 %v2169_v8 }
 0x402   : > { %3364 = vmatpush3.msra.mxu0 %v2169_v8  ;;  %v2202_v8 = vld [vmem:[%s5016_s7 + $0xd0] sm:$0xff] }
 0x403   : > { %3365 = vmatprep.subr.mxu0 %v2168_v19 }
 0x404   : > { %3366 = vmatpush3.msra.mxu0 %v2168_v19  ;;  %v2204_v19 = vld [vmem:[%s5016_s7 + $0xe0] sm:$0xff] }
 0x405   : > { %3367 = vmatprep.subr.mxu0 %v2167_v17 }
 0x406   : > { %3368 = vmatpush3.msra.mxu0 %v2167_v17  ;;  %v2206_v17 = vld [vmem:[%s5016_s7 + $0xf0] sm:$0xff] }
 0x407   : > { %3369 = vmatprep.subr.mxu0 %v2166_v20 }
 0x408   : > { %3370 = vmatpush3.msra.mxu0 %v2166_v20  ;;  %v2658_v20 = vld [vmem:[%s5018_s9 + $0x8] sm:$0xff] }
 0x409   : > { %3371 = vmatprep.subr.mxu0 %v2165_v24  ;;  %2737 = vmatprep.mubr.f32.mxu1 %v2658_v20 }
 0x40a   : > { %3372 = vmatpush3.msra.mxu0 %v2165_v24 }
 0x40b   : > { %3373 = vmatprep.subr.mxu0 %v2164_v37 }
 0x40c   : > { %3374 = vmatpush3.msra.mxu0 %v2164_v37 }
 0x40d   : > { %3375 = vmatprep.subr.mxu0 %v2163_v21 }
 0x40e   : > { %3376 = vmatpush3.msra.mxu0 %v2163_v21 }
 0x40f   : > { %3377 = vmatprep.subr.mxu0 %v2162_v39 }
 0x410   : > { %3378 = vmatpush3.msra.mxu0 %v2162_v39 }
 0x411   : > { %3379 = vmatprep.subr.mxu0 %v2161_v27 }
 0x412   : > { %3380 = vmatpush3.msra.mxu0 %v2161_v27 }
 0x413   : > { %3381 = vmatprep.subr.mxu0 %v2160_v36 }
 0x414   : > { %3382 = vmatpush3.msra.mxu0 %v2160_v36 }
 0x415   : > { %3384 = vmatmul.mubr.f32.vlgmr.msra.gmra.mxu0 %v2177_v7 }
 0x416   : > { %3386 = vmatprep.mubr.f32.mxu0 %v2178_v45 }
 0x419   : > { %3387 = vmatmul.mubr.f32.gmra.mxu0 %v2179_v40 }
 0x41a   : > { %3389 = vmatprep.mubr.f32.mxu0 %v2180_v33 }
 0x41d   : > { %3390 = vmatmul.mubr.f32.gmra.mxu0 %v2181_v59 }
 0x41e   : > { %3392 = vmatprep.mubr.f32.mxu0 %v2182_v12 }
 0x421   : > { %3393 = vmatmul.mubr.f32.gmra.mxu0 %v2183_v42 }
 0x422   : > { %3395 = vmatprep.mubr.f32.mxu0 %v2184_v47 }
 0x425   : > { %3396 = vmatmul.mubr.f32.gmra.mxu0 %v2185_v34 }
 0x426   : > { %3398 = vmatprep.mubr.f32.mxu0 %v2186_v23 }
 0x429   : > { %3399 = vmatmul.mubr.f32.gmra.mxu0 %v2187_v61 }
 0x42a   : > { %3401 = vmatprep.mubr.f32.mxu0 %v2188_v51 }
 0x42d   : > { %3402 = vmatmul.mubr.f32.gmra.mxu0 %v2189_v26 }
 0x42e   : > { %3404 = vmatprep.mubr.f32.mxu0 %v2190_v35 }
 0x431   : > { %3405 = vmatmul.mubr.f32.gmra.mxu0 %v2191_v6 }
 0x432   : > { %3407 = vmatprep.mubr.f32.mxu0 %v2192_v44 }
 0x435   : > { %3408 = vmatmul.mubr.f32.gmra.mxu0 %v2193_v28 }
 0x436   : > { %3410 = vmatprep.mubr.f32.mxu0 %v2194_v60 }
 0x439   : > { %3411 = vmatmul.mubr.f32.gmra.mxu0 %v2195_v57 }
 0x43a   : > { %3413 = vmatprep.mubr.f32.mxu0 %v2196_v49 }
 0x43d   : > { %3414 = vmatmul.mubr.f32.gmra.mxu0 %v2197_v62 }
 0x43e   : > { %3416 = vmatprep.mubr.f32.mxu0 %v2198_v32 }
 0x441   : > { %3417 = vmatmul.mubr.f32.gmra.mxu0 %v2199_v9 }
 0x442   : > { %3419 = vmatprep.mubr.f32.mxu0 %v2200_v46 }
 0x445   : > { %3420 = vmatmul.mubr.f32.gmra.mxu0 %v2201_v50 }
 0x446   : > { %3422 = vmatprep.mubr.f32.mxu0 %v2202_v8 }
 0x449   : > { %3423 = vmatmul.mubr.f32.gmra.mxu0 %v2203_v63 }
 0x44a   : > { %3425 = vmatprep.mubr.f32.mxu0 %v2204_v19 }
 0x44d   : > { %3426 = vmatmul.mubr.f32.gmra.mxu0 %v2205_v38 }
 0x44e   : > { %3428 = vmatprep.mubr.f32.mxu0 %v2206_v17 }
 0x451   : > { %3429 = vmatmul.mubr.f32.gmra.mxu0 %v2207_v31 }
 0x4d5   : > { %v4880_v0 = vpop.f32.mrf.mxu0 }
 0x4d7   : > { %v4882_v24 = vpop.f32.mrf.mxu0 }
 0x4d9   : > { %v4884_v4 = vpop.f32.mrf.mxu0 }
 0x4db   : > { %v4886_v37 = vpop.f32.mrf.mxu0 }
 0x4dd   : > { %v4888_v2 = vpop.f32.mrf.mxu0 }
 0x4df   : > { %v4890_v21 = vpop.f32.mrf.mxu0 }
 0x4e1   : > { %v4892_v25 = vpop.f32.mrf.mxu0 }
 0x4e3   : > { %v4894_v39 = vpop.f32.mrf.mxu0 }
 0x4e5   : > { %v3397_v27 = vpop.f32.mrf.mxu0 }
 0x4e7   : > { %v2506_v36 = vpop.f32.mrf.mxu0 }
 0x4e9   : > { %v3400_v7 = vpop.f32.mrf.mxu0 }
 0x4eb   : > { %v2516_v45 = vpop.f32.mrf.mxu0 }
 0x4ed   : > { %v3403_v40 = vpop.f32.mrf.mxu0 }
 0x4ee   : > { %v2532_v38 = vadd.f32 %v3403_v40, %v4693_v15 }
 0x4ef   : > { %v2526_v33 = vpop.f32.mrf.mxu0 }
 0x4f1   : > { %v3406_v59 = vpop.f32.mrf.mxu0 }
 0x4f2   : > { %v2542_v62 = vadd.f32 %v3406_v59, %v4685_v56  ;;  %v2527_v56 = vadd.f32 %v2526_v33, %v4697_v16 }
 0x4f3   : > { %v2536_v12 = vpop.f32.mrf.mxu0 }
 0x4f4   : > { %v2537_v46 = vadd.f32 %v2536_v12, %v4689_v58  ;;  %v2640_v17 = vmax.f32 %v2542_v62, 0.0  ;;  %v2638_v12 = vmax.f32 %v2532_v38, 0.0  ;;  %v2637_v40 = vmax.f32 %v2527_v56, 0.0  ;;  %v5111_v62 = vld [vmem:[#allocation12_spill] sm:$0xff]  ;;  %v5115_v38 = vld [vmem:[#allocation26_spill] sm:$0xff] }
 0x4f5   : > { %v4896_v42 = vpop.f32.mrf.mxu0 }
 0x4f6   : > { %v2639_v59 = vmax.f32 %v2537_v46, 0.0 }
 0x4f7   : > { %v4898_v47 = vpop.f32.mrf.mxu0 }
 0x4f9   : > { %v4900_v34 = vpop.f32.mrf.mxu0 }
 0x4fb   : > { %v4902_v23 = vpop.f32.mrf.mxu0 }
 0x4fd   : > { %v3415_v61 = vpop.f32.mrf.mxu0 }
 0x4ff   : > { %v4904_v51 = vpop.f32.mrf.mxu0 }
 0x501   : > { %v3418_v26 = vpop.f32.mrf.mxu0 }
 0x503   : > { %v2576_v35 = vpop.f32.mrf.mxu0 }
 0x505   : > { %v3421_v6 = vpop.f32.mrf.mxu0 }
 0x506   : > { %v2592_v16 = vadd.f32 %v3421_v6, %v4711_v55  ;;  %v2502_v55 = vadd.f32 %v4892_v25, %v4720_v48  ;;  %v5107_v48 = vld [vmem:[#allocation11_spill] sm:$0xff] }
 0x507   : > { %v2586_v44 = vpop.f32.mrf.mxu0  ;;  %v2567_v25 = vadd.f32 %v4904_v51, %v5107_v48  ;;  %v2557_v51 = vadd.f32 %v4902_v23, %v5111_v62  ;;  %v2547_v23 = vadd.f32 %v4898_v47, %v5115_v38  ;;  %v2660_v47 = vld [vmem:[%s5018_s9 + $0x18] sm:$0xff] }
 0x509   : > { %v3424_v28 = vpop.f32.mrf.mxu0 }
 0x50b   : > { %v2596_v60 = vpop.f32.mrf.mxu0 }
 0x50d   : > { %v3427_v57 = vpop.f32.mrf.mxu0 }
 0x50e   : > { %v2612_v8 = vadd.f32 %v3427_v57, %v4695_v52  ;;  %v2522_v52 = vadd.f32 %v3400_v7, %v4701_v29  ;;  %v2587_v29 = vadd.f32 %v2586_v44, %v4718_v53  ;;  %v2497_v53 = vadd.f32 %v4894_v39, %v4724_v43  ;;  %v5109_v39 = vld [vmem:[#allocation22_spill] sm:$0xff] }
 0x50f   : > { %v2606_v49 = vpop.f32.mrf.mxu0 }
 0x510   : > { %v2607_v31 = vadd.f32 %v2606_v49, %v4699_v18  ;;  %v2654_v58 = vmax.f32 %v2612_v8, 0.0  ;;  %v2517_v18 = vadd.f32 %v2516_v45, %v4705_v11  ;;  %v2582_v11 = vadd.f32 %v3418_v26, %v4722_v3  ;;  %v5110_v49 = vld [vmem:[#allocation16_spill] sm:$0xff] }
 0x511   : > { %v3430_v32 = vpop.f32.mrf.mxu0  ;;  %v2650_v45 = vmax.f32 %v2592_v16, 0.0  ;;  %v2492_v3 = vadd.f32 %v4888_v2, %v4728_v1  ;;  %v2632_v26 = vmax.f32 %v2502_v55, 0.0  ;;  %v2631_v43 = vmax.f32 %v2497_v53, 0.0  ;;  %v2761_v55 = vld [vmem:[%s5117_s22] sm:$0xf]  ;;  %s3506_s22 = sshll.u32 %s3568_s1, 4  ;;  %s3507_s22 = int_to_ptr.vmem [resolvable:$false] %s3506_s22 }
 0x512   : > { %v2622_v9 = vadd.f32 %v3430_v32, %v4687_v10  ;;  %v2602_v10 = vadd.f32 %v3424_v28, %v4703_v41  ;;  %v2653_v15 = vmax.f32 %v2607_v31, 0.0  ;;  %v2512_v41 = vadd.f32 %v3397_v27, %v4709_v22  ;;  %v5116_v31 = vld [vmem:[#allocation18_spill] sm:$0xff]  ;;  %s3508_s2 = scalar_lea.vmem %s3507_s22, 128  ;;  %p3509_p0 = scmp.lt.s32.totalorder %s4965_s28, %s3507_s22 }
 0x513   : > { %v2616_v50 = vpop.f32.mrf.mxu0  ;;  %v2636_v28 = vmax.f32 %v2522_v52, 0.0  ;;  %v2577_v22 = vadd.f32 %v2576_v35, %v4726_v13  ;;  %v2649_v27 = vmax.f32 %v2587_v29, 0.0  ;;  %v5108_v35 = vld [vmem:[#allocation9_spill] sm:$0xff]  ;;  %v2482_v1 = vadd.f32 %v4884_v4, %v5110_v49  ;;  %p3510_p1 = scmp.lt.s32.totalorder %s3508_s2, %s3502_s11 }
 0x514   : > { %v2656_v63 = vmax.f32 %v2622_v9, 0.0  ;;  %v2617_v19 = vadd.f32 %v2616_v50, %v4691_v14  ;;  %v2597_v14 = vadd.f32 %v2596_v60, %v4707_v54  ;;  %v2652_v33 = vmax.f32 %v2602_v10, 0.0  ;;  %v5112_v9 = vld [vmem:[#allocation13_spill] sm:$0xff]  ;;  %v5113_v50 = vld [vmem:[#allocation20_spill] sm:$0xff] }
 0x515   : > { %v2507_v54 = vadd.f32 %v2506_v36, %v4713_v5  ;;  %v2635_v60 = vmax.f32 %v2517_v18, 0.0  ;;  %v2634_v6 = vmax.f32 %v2512_v41, 0.0  ;;  %v2572_v5 = vadd.f32 %v3415_v61, %v4730_v30  ;;  %p3511_p2 = por %p3510_p1, %p3509_p0 }
 0x516   : > { %v2655_v20 = vmax.f32 %v2617_v19, 0.0  ;;  %3150 = vmatprep.subr.mxu1 %v2656_v63  ;;  %v2651_v7 = vmax.f32 %v2597_v14, 0.0  ;;  %v2648_v36 = vmax.f32 %v2582_v11, 0.0  ;;  %v2647_v13 = vmax.f32 %v2577_v22, 0.0  ;;  %v5114_v63 = vld [vmem:[#allocation17_spill] sm:$0xff] }
 0x517   : > { %3151 = vmatpush3.msra.mxu1 %v2640_v17  ;;  %v2633_v44 = vmax.f32 %v2507_v54, 0.0  ;;  %v2487_v57 = vadd.f32 %v4890_v21, %v5108_v35  ;;  %v2562_v30 = vadd.f32 %v4900_v34, %v5109_v39  ;;  %v2646_v61 = vmax.f32 %v2572_v5, 0.0  ;;  %p3512_p3 = pnand %p3511_p2, %p3505_p13 }
 0x518   : > { %3152 = vmatprep.subr.mxu1 %v2655_v20  ;;  %v2630_v2 = vmax.f32 %v2492_v3, 0.0  ;;  %v2645_v32 = vmax.f32 %v2567_v25, 0.0  ;;  %v2477_v21 = vadd.f32 %v4886_v37, %v5112_v9  ;;  %v2552_v34 = vadd.f32 %v4896_v42, %v5113_v50 }
 0x519   : > { %3153 = vmatpush3.msra.mxu1 %v2639_v59  ;;  %v2629_v46 = vmax.f32 %v2487_v57, 0.0  ;;  %v2644_v8 = vmax.f32 %v2562_v30, 0.0  ;;  %v2472_v4 = vadd.f32 %v4880_v0, %v5114_v63  ;;  %v2628_v19 = vmax.f32 %v2482_v1, 0.0  ;;  %v2657_v0 = vld [vmem:[%s5018_s9] sm:$0xff] }
 0x51a   : > { %3154 = vmatprep.subr.mxu1 %v2654_v58  ;;  %v2643_v17 = vmax.f32 %v2557_v51, 0.0  ;;  %v2467_v37 = vadd.f32 %v4882_v24, %v5116_v31  ;;  %v2627_v20 = vmax.f32 %v2477_v21, 0.0  ;;  %v2642_v56 = vmax.f32 %v2552_v34, 0.0  ;;  %v2659_v24 = vld [vmem:[%s5018_s9 + $0x10] sm:$0xff] }
 0x51b   : > { %3155 = vmatpush3.msra.mxu1 %v2638_v12  ;;  %v2626_v42 = vmax.f32 %v2472_v4, 0.0  ;;  %v2641_v59 = vmax.f32 %v2547_v23, 0.0  ;;  %v3566_v58 = vmov 0.0   ;;  %v2756_v12 = vpop.xlane.xlu1 %2755 }
 0x51c   : > { %3156 = vmatprep.subr.mxu1 %v2653_v15  ;;  %v2625_v10 = vmax.f32 %v2467_v37, 0.0  ;;  %v2758_v15 = vpop.xlane.xlu0 %2757 }
 0x51d   : > { %3157 = vmatpush3.msra.mxu1 %v2637_v40  ;;  %v2760_v29 = vmul.f32 0.0078125, %v2758_v15 }
 0x51e   : > { %3158 = vmatprep.subr.mxu1 %v2652_v33 }
 0x51f   : > { %3159 = vmatpush3.msra.mxu1 %v2636_v28  ;;  %v2666_v41 = vpop.permute.xlu1 %2665 }
 0x520   : > { %3160 = vmatprep.subr.mxu1 %v2651_v7  ;;  %v2671_v28 = vpop.permute.xlu0 %2670 }
 0x521   : > { %3161 = vmatpush3.msra.mxu1 %v2635_v60  ;;  %v2759_v60 = vmul.f32 0.0078125, %v2756_v12 }
 0x522   : > { %3162 = vmatprep.subr.mxu1 %v2650_v45 }
 0x523   : > { %3163 = vmatpush3.msra.mxu1 %v2634_v6 }
 0x524   : > { %3164 = vmatprep.subr.mxu1 %v2649_v27 }
 0x525   : > { %3165 = vmatpush3.msra.mxu1 %v2633_v44 }
 0x526   : > { %3166 = vmatprep.subr.mxu1 %v2648_v36 }
 0x527   : > { %3167 = vmatpush3.msra.mxu1 %v2632_v26 }
 0x528   : > { %3168 = vmatprep.subr.mxu1 %v2647_v13 }
 0x529   : > { %3169 = vmatpush3.msra.mxu1 %v2631_v43 }
 0x52a   : > { %3170 = vmatprep.subr.mxu1 %v2646_v61 }
 0x52b   : > { %3171 = vmatpush3.msra.mxu1 %v2630_v2 }
 0x52c   : > { %3172 = vmatprep.subr.mxu1 %v2645_v32 }
 0x52d   : > { %3173 = vmatpush3.msra.mxu1 %v2629_v46 }
 0x52e   : > { %3174 = vmatprep.subr.mxu1 %v2644_v8 }
 0x52f   : > { %3175 = vmatpush3.msra.mxu1 %v2628_v19 }
 0x530   : > { %3176 = vmatprep.subr.mxu1 %v2643_v17 }
 0x531   : > { %3177 = vmatpush3.msra.mxu1 %v2627_v20 }
 0x532   : > { %3178 = vmatprep.subr.mxu1 %v2642_v56 }
 0x533   : > { %3179 = vmatpush3.msra.mxu1 %v2626_v42 }
 0x534   : > { %3180 = vmatprep.subr.mxu1 %v2641_v59 }
 0x535   : > { %3181 = vmatpush3.msra.mxu1 %v2625_v10 }
 0x536   : > { %2738 = vmatmul.mubr.f32.vlgmr.msra.gmra.mxu1 %v2657_v0  ;;  %3431 = vmatprep.subr.mxu1 %v3566_v58 }
 0x537   : > { %2742 = vmatprep.mubr.f32.mxu1 %v2660_v47 }
 0x53a   : > { %2743 = vmatmul.mubr.f32.gmra.mxu1 %v2659_v24 }
 0x53b   : > { %3435 = vmatprep.mubr.msk.f32.mxu1 %vm3567_vm2, %v3566_v58 }
 0x5f6   : > { %v3182_v52 = vpop.f32.mrf.mxu1 }
 0x5f8   : > { %v3183_v14 = vpop.f32.mrf.mxu1 }
 0x5f9   : > { %v3184_v40 = vadd.f32 %v3183_v14, %v3182_v52 }
 0x5fa   : > { %v3185_v18 = vpop.f32.mrf.mxu1 }
 0x5fb   : > { %v2740_v7 = vadd.f32 %v3184_v40, %v2666_v41 }
 0x5fc   : > { %v3186_v16 = vpop.f32.mrf.mxu1 }
 0x5fd   : > { %v3187_v33 = vadd.f32 %v3186_v16, %v3185_v18  ;;  %v2762_v45 = vmul.f32 %v2759_v60, %v2740_v7 }
 0x5ff   : > { %v2745_v54 = vadd.f32 %v3187_v33, %v2671_v28 }
 0x601   : > { %v2763_v11 = vmul.f32 %v2760_v29, %v2745_v54 }
 0x603   : > { %3432 = vmatpush3.msra.mxu1 %v2763_v11 }
 0x604   : > { %3433 = vmatprep.subr.mxu1 %v3566_v58 }
 0x605   : > { %3434 = vmatpush3.msra.mxu1 %v2762_v45 }
 0x606   : > { %3436 = vmatmul.mubr.msk.f32.vlgmr.msra.gmra.mxu1 %vm2764_vm3, %v2761_v55 }
 0x6c6   : > { %v2834_v6 = vpop.f32.mrf.mxu1 }
 0x6c7   : > { %2838 = vst [vmem:[%s606_s24] sm:$0xf] %v2834_v6 }
 0x6c8   : > { %v3437_v22 = vpop.f32.mrf.mxu1 }
 0x6c9   : > { %3515 = shalt.err (!%p3512_p3)
}
 0x6ca   : > { %s3516_s24 = scalar_lea.hbm %s4970_s20, 64  ;;  %s3520_s14 = scalar_lea.hbm %s5028_s19, 128 }
 0x6cb   : > { %p3517_p4 = scmp.ne.s32.totalorder %s4970_s20, %s3516_s24  ;;  %p3521_p9 = scmp.lt.s32.totalorder %s4970_s20, %s5028_s19 }
 0x6cc   : > { %p3522_p10 = scmp.lt.s32.totalorder %s3520_s14, %s3516_s24 }
 0x6cd   : > { %p3518_p7 = pnand %p3517_p4, %p3707_p5 }
 0x6ce   : > { %p3523_p11 = por %p3522_p10, %p3521_p9 }
 0x6cf   : > { %p3519_p8 = pneg %p3518_p7 }
 0x6d1   : > { %p3524_p12 = pnand %p3523_p11, %p3519_p8 }
 0x6d3   : > { %3527 = shalt.err (!%p3524_p12)
}
 0x6d4   : > { %3438 = dma.vmem_to_hbm [thread:$0]  (%p3707_p5), %s4965_s28, 64, %s4970_s20, %s2840_s25  }
 0x6d5 PF: > { %p3444_p13 = scmp.ge.s32.totalorder %s3562_s21, 2  ;;  %s2865_s11 = sand.u32 1, %s3550_s0  }
 0x6d6   : > { %s2866_s22 = scalar_lea.sflag [#allocation3], %s2865_s11 }
 0x6d7   : > { %p3441_p0 = pnand %p3444_p13, %p3711_p6 }
 0x6d9   : > { %p3442_p1 = pneg %p3441_p0 }
 0x6db   : > { %3545 = dma.done.wait (%p3442_p1), %s2866_s22, 64  }
 0x6dc   : > { %3547 = vsyncadd (%p3442_p1), %s2866_s22, 4294967232  ;;  %s5118_s21 = sld [smem:[#allocation6_spill]]  ;;  %s5121_s0 = smov %s3554_s30 }
 0x6dd   : > { %s5119_s2 = sld [smem:[#allocation5_spill]] }
 0x6de   : > { %s5120_s20 = sld [smem:[#allocation7_spill]] }
 0x6e2   : > { %p29_p2 = scmp.ge.s32.totalorder %s5118_s21, 4  }
 0x6e3   : > { %s5122_s30 = smov %s5119_s2 }
 0x6e4   :  { %31 = sbr.rel (!%p29_p2) target bundleno = 11 (0xb), region = 134 }
 0x6e9   :  { %2871 = vsyncpa [#allocation3], 1 }
 0x6ea   :  { %2873 = vsyncpa [#allocation3 + $0x1], 1 }

</bundles_post_ra>
